<compile_context>
chip_gen: v6e
topology: v6e:2x2x1
jax: 0.10.0
libtpu: 0.0.40
codegen_flags: <defaults>
</compile_context>

<pallas_src>
import functools

import jax
import jax.numpy as jnp
from jax.experimental import pallas as pl
from jax.experimental.pallas import tpu as pltpu


# ---------------------------------------------------------------------------
# Fused kernel: qkv linear -> per-head softmax attention (+prefix) -> proj
# ---------------------------------------------------------------------------
def _fused_pret_attn_kernel(*refs, num_heads, has_prompt):
    if has_prompt:
        (x_ref, kp_ref, vp_ref, wqkv_ref, bqkv_ref, wproj_ref, bproj_ref,
         o_ref, qkv_scr) = refs
    else:
        (x_ref, wqkv_ref, bqkv_ref, wproj_ref, bproj_ref,
         o_ref, qkv_scr) = refs
        kp_ref = vp_ref = None

    N = x_ref.shape[1]
    C = x_ref.shape[2]
    H = num_heads
    hd = C // H
    cd = qkv_scr.dtype          # compute dtype == input dtype (bf16 fast path)

    # QKV projection: (N, C) @ (C, 3C), f32 accumulation, slab stored in the
    # compute dtype so the attention dots consume compute-dtype operands.
    # The softmax scale is already folded into the Q columns of w_qkv/b_qkv.
    x = x_ref[0]
    qkv = jnp.dot(x, wqkv_ref[...], preferred_element_type=jnp.float32)
    qkv = qkv + bqkv_ref[...].astype(jnp.float32)
    qkv_scr[...] = qkv.astype(cd)

    if has_prompt:
        kp = kp_ref[0]          # (P, C), lane-dense, already compute dtype
        vp = vp_ref[0]

    # Per-head attention.  Head extraction is static lane-slicing of the
    # (N, 3C) slab -- no in-kernel reshape/transpose, no HBM K/V concat.
    ctx_heads = []
    for h in range(H):
        lo, hi = h * hd, (h + 1) * hd
        q_h = qkv_scr[:, lo:hi]                        # (N, hd)
        k_h = qkv_scr[:, C + lo:C + hi]                # (N, hd)
        v_h = qkv_scr[:, 2 * C + lo:2 * C + hi]        # (N, hd)

        s_self = jax.lax.dot_general(                  # (N, N) f32
            q_h, k_h, (((1,), (1,)), ((), ())),
            preferred_element_type=jnp.float32)
        m = jnp.max(s_self, axis=-1, keepdims=True)

        if has_prompt:
            s_pre = jax.lax.dot_general(               # (N, P) f32
                q_h, kp[:, lo:hi], (((1,), (1,)), ((), ())),
                preferred_element_type=jnp.float32)
            m = jnp.maximum(m, jnp.max(s_pre, axis=-1, keepdims=True))

        # Joint (prefix + self) numerically-stable softmax; stats stay f32,
        # probabilities go back to the compute dtype for the P.V matmuls.
        p_self = jnp.exp(s_self - m)
        denom = jnp.sum(p_self, axis=-1, keepdims=True)
        ctx = jnp.dot(p_self.astype(cd), v_h,
                      preferred_element_type=jnp.float32)

        if has_prompt:
            p_pre = jnp.exp(s_pre - m)
            denom = denom + jnp.sum(p_pre, axis=-1, keepdims=True)
            ctx = ctx + jnp.dot(p_pre.astype(cd), vp[:, lo:hi],
                                preferred_element_type=jnp.float32)

        # attn_drop has p=0.0 -> identity.  denom >= 1, approx recip is safe.
        ctx_heads.append(ctx * pl.reciprocal(denom, approx=True))

    # Single lane-dense (N, C) context slab (no per-head masked stores).
    ctx_full = ctx_heads[0] if H == 1 else jnp.concatenate(ctx_heads, axis=-1)

    # Output projection; proj_drop identity.
    out = jnp.dot(ctx_full.astype(cd), wproj_ref[...],
                  preferred_element_type=jnp.float32)
    out = out + bproj_ref[...].astype(jnp.float32)
    o_ref[0] = out.astype(o_ref.dtype)


# ---------------------------------------------------------------------------
# Wrapper
# ---------------------------------------------------------------------------
def pret_attention(x, prompt, params, num_heads):
    B, N, C = x.shape
    assert C % num_heads == 0
    hd = C // num_heads
    scale = float(hd) ** -0.5
    cd = x.dtype                               # compute dtype follows input

    # Parameter prep: fold the softmax scale into the Q columns of the qkv
    # projection (scaling q is mathematically identical to scaling q @ k^T),
    # and present weights in the compute dtype (no f32 upcast for bf16).
    w_qkv = params["w_qkv"]                    # (C, 3C)  (pre-transposed)
    b_qkv = params["b_qkv"]
    w_qkv = jnp.concatenate([w_qkv[:, :C] * scale, w_qkv[:, C:]],
                            axis=1).astype(cd)
    b_qkv = jnp.concatenate([b_qkv[:C] * scale, b_qkv[C:]]).reshape(1, 3 * C)
    w_proj = params["w_proj"].astype(cd)       # (C, C)
    b_proj = params["b_proj"].reshape(1, C)

    has_prompt = prompt is not None
    args = [x]
    in_specs = [pl.BlockSpec((1, N, C), lambda b: (b, 0, 0))]
    if has_prompt:
        # Module contract: prompt is (B, 2, P, H, hd).  Deliver the prefix
        # lane-dense as (B, P, C) slabs (head h at columns h*hd:(h+1)*hd),
        # matching the self-K/V slab layout -- one dense tile per batch,
        # no per-head padded (P, hd)-minor DMA, no HBM K/V concat.
        assert prompt.ndim == 5 and prompt.shape[0] == B
        assert prompt.shape[1] == 2
        assert prompt.shape[3] == num_heads and prompt.shape[4] == hd, (
            f"prompt.shape: {prompt.shape} does not match "
            f"(B, 2, P, {num_heads}, {hd})")
        P = prompt.shape[2]
        key_prefix = prompt[:, 0].reshape(B, P, C).astype(cd)
        value_prefix = prompt[:, 1].reshape(B, P, C).astype(cd)
        prefix_spec = pl.BlockSpec((1, P, C), lambda b: (b, 0, 0))
        args += [key_prefix, value_prefix]
        in_specs += [prefix_spec, prefix_spec]

    args += [w_qkv, b_qkv, w_proj, b_proj]
    in_specs += [
        pl.BlockSpec((C, 3 * C), lambda b: (0, 0)),
        pl.BlockSpec((1, 3 * C), lambda b: (0, 0)),
        pl.BlockSpec((C, C), lambda b: (0, 0)),
        pl.BlockSpec((1, C), lambda b: (0, 0)),
    ]

    kern = functools.partial(_fused_pret_attn_kernel, num_heads=num_heads,
                             has_prompt=has_prompt)
    return pl.pallas_call(
        kern,
        out_shape=jax.ShapeDtypeStruct((B, N, C), x.dtype),
        grid=(B,),
        in_specs=in_specs,
        out_specs=pl.BlockSpec((1, N, C), lambda b: (b, 0, 0)),
        scratch_shapes=[pltpu.VMEM((N, 3 * C), cd)],
        compiler_params=pltpu.CompilerParams(
            dimension_semantics=("parallel",),
            vmem_limit_bytes=64 * 1024 * 1024),
    )(*args)


# ---------------------------------------------------------------------------
# Pure-JAX reference for verification.
# ---------------------------------------------------------------------------
def pret_attention_ref(x, prompt, params, num_heads):
    B, N, C = x.shape
    hd = C // num_heads
    scale = hd ** (-0.5)
    qkv = x.reshape(B * N, C) @ params["w_qkv"] + params["b_qkv"]
    qkv = qkv.reshape(B, N, 3, num_heads, hd).transpose(2, 0, 3, 1, 4)
    q, k, v = qkv[0], qkv[1], qkv[2]
    if prompt is not None:
        pr = jnp.transpose(prompt, (1, 0, 3, 2, 4))
        k = jnp.concatenate([pr[0], k], axis=2)
        v = jnp.concatenate([pr[1], v], axis=2)
    attn = jnp.einsum("bhnd,bhld->bhnl", q, k) * scale
    attn = jax.nn.softmax(attn, axis=-1)
    o = jnp.einsum("bhnl,bhld->bhnd", attn, v)
    o = jnp.transpose(o, (0, 2, 1, 3)).reshape(B, N, C)
    return (o.reshape(B * N, C) @ params["w_proj"]
            + params["b_proj"]).reshape(B, N, C)


# ---------------------------------------------------------------------------
if __name__ == "__main__":
    B, N, C = 2, 8, 32
    num_heads = 8
    head_dim = C // num_heads      # 4
    P = 4                          # prompt prefix length

    key = jax.random.PRNGKey(0)
    kx, kp, k1, k2, k3 = jax.random.split(key, 5)

    x = jax.random.normal(kx, (B, N, C), dtype=jnp.float32)
    prompt = jax.random.normal(kp, (B, 2, P, num_heads, head_dim),
                               dtype=jnp.float32)

    # Deterministic params (qkv_bias=False => zero qkv bias; proj has bias).
    # nn.Linear weight is (out, in); stored here pre-transposed to (in, out).
    params = {
        "w_qkv": 0.05 * jax.random.normal(k1, (C, 3 * C), dtype=jnp.float32),
        "b_qkv": jnp.zeros((3 * C,), dtype=jnp.float32),
        "w_proj": 0.05 * jax.random.normal(k2, (C, C), dtype=jnp.float32),
        "b_proj": 0.01 * jax.random.normal(k3, (C,), dtype=jnp.float32),
    }

    # With prompt prefix.
    out = jax.block_until_ready(pret_attention(x, prompt, params, num_heads))
    ref = jax.block_until_ready(pret_attention_ref(x, prompt, params, num_heads))
    assert out.shape == (B, N, C)
    assert jnp.allclose(out, ref, atol=2e-3, rtol=2e-3), "mismatch (prompt)"

    # prompt=None path of the module.
    out_np = jax.block_until_ready(pret_attention(x, None, params, num_heads))
    ref_np = jax.block_until_ready(pret_attention_ref(x, None, params, num_heads))
    assert jnp.allclose(out_np, ref_np, atol=2e-3, rtol=2e-3), "mismatch (no prompt)"

    print("KERNEL_OK")
</pallas_src>

<mosaic_0001>
module attributes {stable_mosaic.version = 11 : i64} {
  func.func @_fused_pret_attn_kernel(%arg0: i32, %arg1: memref<1x8x32xf32, #tpu.memory_space<vmem>>, %arg2: memref<1x4x32xf32, #tpu.memory_space<vmem>>, %arg3: memref<1x4x32xf32, #tpu.memory_space<vmem>>, %arg4: memref<32x96xf32, #tpu.memory_space<vmem>>, %arg5: memref<1x96xf32, #tpu.memory_space<vmem>>, %arg6: memref<32x32xf32, #tpu.memory_space<vmem>>, %arg7: memref<1x32xf32, #tpu.memory_space<vmem>>, %arg8: memref<1x8x32xf32, #tpu.memory_space<vmem>>, %arg9: memref<8x96xf32, #tpu.memory_space<vmem>>) attributes {dimension_semantics = [#tpu.dimension_semantics<parallel>], iteration_bounds = array<i64: 2>, scalar_prefetch = 0 : i64, scratch_operands = 1 : i64, tpu.core_type = #tpu.core_type<tc>, window_params = [{transform_indices = @transform_0, window_bounds = array<i64: 1, 8, 32>}, {transform_indices = @transform_1, window_bounds = array<i64: 1, 4, 32>}, {transform_indices = @transform_2, window_bounds = array<i64: 1, 4, 32>}, {pipeline_mode = #tpu.pipeline_mode<synchronous>, transform_indices = @transform_3, window_bounds = array<i64: 32, 96>}, {pipeline_mode = #tpu.pipeline_mode<synchronous>, transform_indices = @transform_4, window_bounds = array<i64: 1, 96>}, {pipeline_mode = #tpu.pipeline_mode<synchronous>, transform_indices = @transform_5, window_bounds = array<i64: 32, 32>}, {pipeline_mode = #tpu.pipeline_mode<synchronous>, transform_indices = @transform_6, window_bounds = array<i64: 1, 32>}, {transform_indices = @transform_7, window_bounds = array<i64: 1, 8, 32>}]} {
    %c0 = arith.constant 0 : index
    %c0_0 = arith.constant 0 : index
    %c0_1 = arith.constant 0 : index
    %0 = vector.load %arg1[%c0, %c0_0, %c0_1] : memref<1x8x32xf32, #tpu.memory_space<vmem>>, vector<1x8x32xf32>
    %1 = vector.shape_cast %0 : vector<1x8x32xf32> to vector<8x32xf32>
    %c0_2 = arith.constant 0 : index
    %c0_3 = arith.constant 0 : index
    %2 = vector.load %arg4[%c0_2, %c0_3] : memref<32x96xf32, #tpu.memory_space<vmem>>, vector<32x96xf32>
    %cst = arith.constant dense<0.000000e+00> : vector<8x96xf32>
    %3 = tpu.matmul %1, %2, %cst {dimension_numbers = #tpu.dot_dimension_numbers<[1], [0], [0], [1], [0, 0, 1, 1], [], []>} : vector<8x32xf32>, vector<32x96xf32>, vector<8x96xf32> -> vector<8x96xf32>
    %c0_4 = arith.constant 0 : index
    %c0_5 = arith.constant 0 : index
    %4 = vector.load %arg5[%c0_4, %c0_5] : memref<1x96xf32, #tpu.memory_space<vmem>>, vector<1x96xf32>
    %5 = vector.broadcast %4 : vector<1x96xf32> to vector<8x96xf32>
    %6 = arith.addf %3, %5 : vector<8x96xf32>
    %c0_6 = arith.constant 0 : index
    %c0_7 = arith.constant 0 : index
    %7 = vector.load %arg9[%c0_6, %c0_7] : memref<8x96xf32, #tpu.memory_space<vmem>>, vector<8x96xf32>
    tpu.vector_store %arg9[%c0_6, %c0_7], %6 {strides = array<i32>} : memref<8x96xf32, #tpu.memory_space<vmem>>, vector<8x96xf32>,
    %c0_8 = arith.constant 0 : index
    %c0_9 = arith.constant 0 : index
    %c0_10 = arith.constant 0 : index
    %8 = vector.load %arg2[%c0_8, %c0_9, %c0_10] : memref<1x4x32xf32, #tpu.memory_space<vmem>>, vector<1x4x32xf32>
    %9 = vector.shape_cast %8 : vector<1x4x32xf32> to vector<4x32xf32>
    %c0_11 = arith.constant 0 : index
    %c0_12 = arith.constant 0 : index
    %c0_13 = arith.constant 0 : index
    %10 = vector.load %arg3[%c0_11, %c0_12, %c0_13] : memref<1x4x32xf32, #tpu.memory_space<vmem>>, vector<1x4x32xf32>
    %11 = vector.shape_cast %10 : vector<1x4x32xf32> to vector<4x32xf32>
    %c0_14 = arith.constant 0 : index
    %c0_15 = arith.constant 0 : index
    %12 = vector.load %arg9[%c0_14, %c0_15] : memref<8x96xf32, #tpu.memory_space<vmem>>, vector<8x4xf32>
    %c0_16 = arith.constant 0 : index
    %c32 = arith.constant 32 : index
    %13 = vector.load %arg9[%c0_16, %c32] : memref<8x96xf32, #tpu.memory_space<vmem>>, vector<8x4xf32>
    %c0_17 = arith.constant 0 : index
    %c64 = arith.constant 64 : index
    %14 = vector.load %arg9[%c0_17, %c64] : memref<8x96xf32, #tpu.memory_space<vmem>>, vector<8x4xf32>
    %cst_18 = arith.constant dense<0.000000e+00> : vector<8x8xf32>
    %15 = tpu.matmul %12, %13, %cst_18 {dimension_numbers = #tpu.dot_dimension_numbers<[1], [1], [0], [0], [0, 0, 1, 0], [], []>} : vector<8x4xf32>, vector<8x4xf32>, vector<8x8xf32> -> vector<8x8xf32>
    %cst_19 = arith.constant dense<0xFF800000> : vector<8xf32>
    %16 = vector.multi_reduction <maximumf>, %15, %cst_19 [1] : vector<8x8xf32> to vector<8xf32>
    %17 = vector.shape_cast %16 : vector<8xf32> to vector<8x1xf32>
    %18 = vector.extract_strided_slice %9 {offsets = [0, 0], sizes = [4, 4], strides = [1, 1]} : vector<4x32xf32> to vector<4x4xf32>
    %cst_20 = arith.constant dense<0.000000e+00> : vector<8x4xf32>
    %19 = tpu.matmul %12, %18, %cst_20 {dimension_numbers = #tpu.dot_dimension_numbers<[1], [1], [0], [0], [0, 0, 1, 0], [], []>} : vector<8x4xf32>, vector<4x4xf32>, vector<8x4xf32> -> vector<8x4xf32>
    %cst_21 = arith.constant dense<0xFF800000> : vector<8xf32>
    %20 = vector.multi_reduction <maximumf>, %19, %cst_21 [1] : vector<8x4xf32> to vector<8xf32>
    %21 = vector.shape_cast %20 : vector<8xf32> to vector<8x1xf32>
    %22 = arith.maximumf %17, %21 : vector<8x1xf32>
    %23 = vector.broadcast %22 : vector<8x1xf32> to vector<8x8xf32>
    %24 = arith.subf %15, %23 : vector<8x8xf32>
    %25 = math.exp %24 : vector<8x8xf32>
    %cst_22 = arith.constant dense<0.000000e+00> : vector<8xf32>
    %26 = vector.multi_reduction <add>, %25, %cst_22 [1] : vector<8x8xf32> to vector<8xf32>
    %27 = vector.shape_cast %26 : vector<8xf32> to vector<8x1xf32>
    %cst_23 = arith.constant dense<0.000000e+00> : vector<8x4xf32>
    %28 = tpu.matmul %25, %14, %cst_23 {dimension_numbers = #tpu.dot_dimension_numbers<[1], [0], [0], [1], [0, 0, 1, 1], [], []>} : vector<8x8xf32>, vector<8x4xf32>, vector<8x4xf32> -> vector<8x4xf32>
    %29 = vector.broadcast %22 : vector<8x1xf32> to vector<8x4xf32>
    %30 = arith.subf %19, %29 : vector<8x4xf32>
    %31 = math.exp %30 : vector<8x4xf32>
    %cst_24 = arith.constant dense<0.000000e+00> : vector<8xf32>
    %32 = vector.multi_reduction <add>, %31, %cst_24 [1] : vector<8x4xf32> to vector<8xf32>
    %33 = vector.shape_cast %32 : vector<8xf32> to vector<8x1xf32>
    %34 = arith.addf %27, %33 : vector<8x1xf32>
    %35 = vector.extract_strided_slice %11 {offsets = [0, 0], sizes = [4, 4], strides = [1, 1]} : vector<4x32xf32> to vector<4x4xf32>
    %cst_25 = arith.constant dense<0.000000e+00> : vector<8x4xf32>
    %36 = tpu.matmul %31, %35, %cst_25 {dimension_numbers = #tpu.dot_dimension_numbers<[1], [0], [0], [1], [0, 0, 1, 1], [], []>} : vector<8x4xf32>, vector<4x4xf32>, vector<8x4xf32> -> vector<8x4xf32>
    %37 = arith.addf %28, %36 : vector<8x4xf32>
    %38 = tpu.reciprocal %34 {approx = true} : vector<8x1xf32> -> vector<8x1xf32>
    %39 = vector.broadcast %38 : vector<8x1xf32> to vector<8x4xf32>
    %40 = arith.mulf %37, %39 : vector<8x4xf32>
    %c0_26 = arith.constant 0 : index
    %c4 = arith.constant 4 : index
    %41 = vector.load %arg9[%c0_26, %c4] : memref<8x96xf32, #tpu.memory_space<vmem>>, vector<8x4xf32>
    %c0_27 = arith.constant 0 : index
    %c36 = arith.constant 36 : index
    %42 = vector.load %arg9[%c0_27, %c36] : memref<8x96xf32, #tpu.memory_space<vmem>>, vector<8x4xf32>
    %c0_28 = arith.constant 0 : index
    %c68 = arith.constant 68 : index
    %43 = vector.load %arg9[%c0_28, %c68] : memref<8x96xf32, #tpu.memory_space<vmem>>, vector<8x4xf32>
    %cst_29 = arith.constant dense<0.000000e+00> : vector<8x8xf32>
    %44 = tpu.matmul %41, %42, %cst_29 {dimension_numbers = #tpu.dot_dimension_numbers<[1], [1], [0], [0], [0, 0, 1, 0], [], []>} : vector<8x4xf32>, vector<8x4xf32>, vector<8x8xf32> -> vector<8x8xf32>
    %cst_30 = arith.constant dense<0xFF800000> : vector<8xf32>
    %45 = vector.multi_reduction <maximumf>, %44, %cst_30 [1] : vector<8x8xf32> to vector<8xf32>
    %46 = vector.shape_cast %45 : vector<8xf32> to vector<8x1xf32>
    %47 = vector.extract_strided_slice %9 {offsets = [0, 4], sizes = [4, 4], strides = [1, 1]} : vector<4x32xf32> to vector<4x4xf32>
    %cst_31 = arith.constant dense<0.000000e+00> : vector<8x4xf32>
    %48 = tpu.matmul %41, %47, %cst_31 {dimension_numbers = #tpu.dot_dimension_numbers<[1], [1], [0], [0], [0, 0, 1, 0], [], []>} : vector<8x4xf32>, vector<4x4xf32>, vector<8x4xf32> -> vector<8x4xf32>
    %cst_32 = arith.constant dense<0xFF800000> : vector<8xf32>
    %49 = vector.multi_reduction <maximumf>, %48, %cst_32 [1] : vector<8x4xf32> to vector<8xf32>
    %50 = vector.shape_cast %49 : vector<8xf32> to vector<8x1xf32>
    %51 = arith.maximumf %46, %50 : vector<8x1xf32>
    %52 = vector.broadcast %51 : vector<8x1xf32> to vector<8x8xf32>
    %53 = arith.subf %44, %52 : vector<8x8xf32>
    %54 = math.exp %53 : vector<8x8xf32>
    %cst_33 = arith.constant dense<0.000000e+00> : vector<8xf32>
    %55 = vector.multi_reduction <add>, %54, %cst_33 [1] : vector<8x8xf32> to vector<8xf32>
    %56 = vector.shape_cast %55 : vector<8xf32> to vector<8x1xf32>
    %cst_34 = arith.constant dense<0.000000e+00> : vector<8x4xf32>
    %57 = tpu.matmul %54, %43, %cst_34 {dimension_numbers = #tpu.dot_dimension_numbers<[1], [0], [0], [1], [0, 0, 1, 1], [], []>} : vector<8x8xf32>, vector<8x4xf32>, vector<8x4xf32> -> vector<8x4xf32>
    %58 = vector.broadcast %51 : vector<8x1xf32> to vector<8x4xf32>
    %59 = arith.subf %48, %58 : vector<8x4xf32>
    %60 = math.exp %59 : vector<8x4xf32>
    %cst_35 = arith.constant dense<0.000000e+00> : vector<8xf32>
    %61 = vector.multi_reduction <add>, %60, %cst_35 [1] : vector<8x4xf32> to vector<8xf32>
    %62 = vector.shape_cast %61 : vector<8xf32> to vector<8x1xf32>
    %63 = arith.addf %56, %62 : vector<8x1xf32>
    %64 = vector.extract_strided_slice %11 {offsets = [0, 4], sizes = [4, 4], strides = [1, 1]} : vector<4x32xf32> to vector<4x4xf32>
    %cst_36 = arith.constant dense<0.000000e+00> : vector<8x4xf32>
    %65 = tpu.matmul %60, %64, %cst_36 {dimension_numbers = #tpu.dot_dimension_numbers<[1], [0], [0], [1], [0, 0, 1, 1], [], []>} : vector<8x4xf32>, vector<4x4xf32>, vector<8x4xf32> -> vector<8x4xf32>
    %66 = arith.addf %57, %65 : vector<8x4xf32>
    %67 = tpu.reciprocal %63 {approx = true} : vector<8x1xf32> -> vector<8x1xf32>
    %68 = vector.broadcast %67 : vector<8x1xf32> to vector<8x4xf32>
    %69 = arith.mulf %66, %68 : vector<8x4xf32>
    %c0_37 = arith.constant 0 : index
    %c8 = arith.constant 8 : index
    %70 = vector.load %arg9[%c0_37, %c8] : memref<8x96xf32, #tpu.memory_space<vmem>>, vector<8x4xf32>
    %c0_38 = arith.constant 0 : index
    %c40 = arith.constant 40 : index
    %71 = vector.load %arg9[%c0_38, %c40] : memref<8x96xf32, #tpu.memory_space<vmem>>, vector<8x4xf32>
    %c0_39 = arith.constant 0 : index
    %c72 = arith.constant 72 : index
    %72 = vector.load %arg9[%c0_39, %c72] : memref<8x96xf32, #tpu.memory_space<vmem>>, vector<8x4xf32>
    %cst_40 = arith.constant dense<0.000000e+00> : vector<8x8xf32>
    %73 = tpu.matmul %70, %71, %cst_40 {dimension_numbers = #tpu.dot_dimension_numbers<[1], [1], [0], [0], [0, 0, 1, 0], [], []>} : vector<8x4xf32>, vector<8x4xf32>, vector<8x8xf32> -> vector<8x8xf32>
    %cst_41 = arith.constant dense<0xFF800000> : vector<8xf32>
    %74 = vector.multi_reduction <maximumf>, %73, %cst_41 [1] : vector<8x8xf32> to vector<8xf32>
    %75 = vector.shape_cast %74 : vector<8xf32> to vector<8x1xf32>
    %76 = vector.extract_strided_slice %9 {offsets = [0, 8], sizes = [4, 4], strides = [1, 1]} : vector<4x32xf32> to vector<4x4xf32>
    %cst_42 = arith.constant dense<0.000000e+00> : vector<8x4xf32>
    %77 = tpu.matmul %70, %76, %cst_42 {dimension_numbers = #tpu.dot_dimension_numbers<[1], [1], [0], [0], [0, 0, 1, 0], [], []>} : vector<8x4xf32>, vector<4x4xf32>, vector<8x4xf32> -> vector<8x4xf32>
    %cst_43 = arith.constant dense<0xFF800000> : vector<8xf32>
    %78 = vector.multi_reduction <maximumf>, %77, %cst_43 [1] : vector<8x4xf32> to vector<8xf32>
    %79 = vector.shape_cast %78 : vector<8xf32> to vector<8x1xf32>
    %80 = arith.maximumf %75, %79 : vector<8x1xf32>
    %81 = vector.broadcast %80 : vector<8x1xf32> to vector<8x8xf32>
    %82 = arith.subf %73, %81 : vector<8x8xf32>
    %83 = math.exp %82 : vector<8x8xf32>
    %cst_44 = arith.constant dense<0.000000e+00> : vector<8xf32>
    %84 = vector.multi_reduction <add>, %83, %cst_44 [1] : vector<8x8xf32> to vector<8xf32>
    %85 = vector.shape_cast %84 : vector<8xf32> to vector<8x1xf32>
    %cst_45 = arith.constant dense<0.000000e+00> : vector<8x4xf32>
    %86 = tpu.matmul %83, %72, %cst_45 {dimension_numbers = #tpu.dot_dimension_numbers<[1], [0], [0], [1], [0, 0, 1, 1], [], []>} : vector<8x8xf32>, vector<8x4xf32>, vector<8x4xf32> -> vector<8x4xf32>
    %87 = vector.broadcast %80 : vector<8x1xf32> to vector<8x4xf32>
    %88 = arith.subf %77, %87 : vector<8x4xf32>
    %89 = math.exp %88 : vector<8x4xf32>
    %cst_46 = arith.constant dense<0.000000e+00> : vector<8xf32>
    %90 = vector.multi_reduction <add>, %89, %cst_46 [1] : vector<8x4xf32> to vector<8xf32>
    %91 = vector.shape_cast %90 : vector<8xf32> to vector<8x1xf32>
    %92 = arith.addf %85, %91 : vector<8x1xf32>
    %93 = vector.extract_strided_slice %11 {offsets = [0, 8], sizes = [4, 4], strides = [1, 1]} : vector<4x32xf32> to vector<4x4xf32>
    %cst_47 = arith.constant dense<0.000000e+00> : vector<8x4xf32>
    %94 = tpu.matmul %89, %93, %cst_47 {dimension_numbers = #tpu.dot_dimension_numbers<[1], [0], [0], [1], [0, 0, 1, 1], [], []>} : vector<8x4xf32>, vector<4x4xf32>, vector<8x4xf32> -> vector<8x4xf32>
    %95 = arith.addf %86, %94 : vector<8x4xf32>
    %96 = tpu.reciprocal %92 {approx = true} : vector<8x1xf32> -> vector<8x1xf32>
    %97 = vector.broadcast %96 : vector<8x1xf32> to vector<8x4xf32>
    %98 = arith.mulf %95, %97 : vector<8x4xf32>
    %c0_48 = arith.constant 0 : index
    %c12 = arith.constant 12 : index
    %99 = vector.load %arg9[%c0_48, %c12] : memref<8x96xf32, #tpu.memory_space<vmem>>, vector<8x4xf32>
    %c0_49 = arith.constant 0 : index
    %c44 = arith.constant 44 : index
    %100 = vector.load %arg9[%c0_49, %c44] : memref<8x96xf32, #tpu.memory_space<vmem>>, vector<8x4xf32>
    %c0_50 = arith.constant 0 : index
    %c76 = arith.constant 76 : index
    %101 = vector.load %arg9[%c0_50, %c76] : memref<8x96xf32, #tpu.memory_space<vmem>>, vector<8x4xf32>
    %cst_51 = arith.constant dense<0.000000e+00> : vector<8x8xf32>
    %102 = tpu.matmul %99, %100, %cst_51 {dimension_numbers = #tpu.dot_dimension_numbers<[1], [1], [0], [0], [0, 0, 1, 0], [], []>} : vector<8x4xf32>, vector<8x4xf32>, vector<8x8xf32> -> vector<8x8xf32>
    %cst_52 = arith.constant dense<0xFF800000> : vector<8xf32>
    %103 = vector.multi_reduction <maximumf>, %102, %cst_52 [1] : vector<8x8xf32> to vector<8xf32>
    %104 = vector.shape_cast %103 : vector<8xf32> to vector<8x1xf32>
    %105 = vector.extract_strided_slice %9 {offsets = [0, 12], sizes = [4, 4], strides = [1, 1]} : vector<4x32xf32> to vector<4x4xf32>
    %cst_53 = arith.constant dense<0.000000e+00> : vector<8x4xf32>
    %106 = tpu.matmul %99, %105, %cst_53 {dimension_numbers = #tpu.dot_dimension_numbers<[1], [1], [0], [0], [0, 0, 1, 0], [], []>} : vector<8x4xf32>, vector<4x4xf32>, vector<8x4xf32> -> vector<8x4xf32>
    %cst_54 = arith.constant dense<0xFF800000> : vector<8xf32>
    %107 = vector.multi_reduction <maximumf>, %106, %cst_54 [1] : vector<8x4xf32> to vector<8xf32>
    %108 = vector.shape_cast %107 : vector<8xf32> to vector<8x1xf32>
    %109 = arith.maximumf %104, %108 : vector<8x1xf32>
    %110 = vector.broadcast %109 : vector<8x1xf32> to vector<8x8xf32>
    %111 = arith.subf %102, %110 : vector<8x8xf32>
    %112 = math.exp %111 : vector<8x8xf32>
    %cst_55 = arith.constant dense<0.000000e+00> : vector<8xf32>
    %113 = vector.multi_reduction <add>, %112, %cst_55 [1] : vector<8x8xf32> to vector<8xf32>
    %114 = vector.shape_cast %113 : vector<8xf32> to vector<8x1xf32>
    %cst_56 = arith.constant dense<0.000000e+00> : vector<8x4xf32>
    %115 = tpu.matmul %112, %101, %cst_56 {dimension_numbers = #tpu.dot_dimension_numbers<[1], [0], [0], [1], [0, 0, 1, 1], [], []>} : vector<8x8xf32>, vector<8x4xf32>, vector<8x4xf32> -> vector<8x4xf32>
    %116 = vector.broadcast %109 : vector<8x1xf32> to vector<8x4xf32>
    %117 = arith.subf %106, %116 : vector<8x4xf32>
    %118 = math.exp %117 : vector<8x4xf32>
    %cst_57 = arith.constant dense<0.000000e+00> : vector<8xf32>
    %119 = vector.multi_reduction <add>, %118, %cst_57 [1] : vector<8x4xf32> to vector<8xf32>
    %120 = vector.shape_cast %119 : vector<8xf32> to vector<8x1xf32>
    %121 = arith.addf %114, %120 : vector<8x1xf32>
    %122 = vector.extract_strided_slice %11 {offsets = [0, 12], sizes = [4, 4], strides = [1, 1]} : vector<4x32xf32> to vector<4x4xf32>
    %cst_58 = arith.constant dense<0.000000e+00> : vector<8x4xf32>
    %123 = tpu.matmul %118, %122, %cst_58 {dimension_numbers = #tpu.dot_dimension_numbers<[1], [0], [0], [1], [0, 0, 1, 1], [], []>} : vector<8x4xf32>, vector<4x4xf32>, vector<8x4xf32> -> vector<8x4xf32>
    %124 = arith.addf %115, %123 : vector<8x4xf32>
    %125 = tpu.reciprocal %121 {approx = true} : vector<8x1xf32> -> vector<8x1xf32>
    %126 = vector.broadcast %125 : vector<8x1xf32> to vector<8x4xf32>
    %127 = arith.mulf %124, %126 : vector<8x4xf32>
    %c0_59 = arith.constant 0 : index
    %c16 = arith.constant 16 : index
    %128 = vector.load %arg9[%c0_59, %c16] : memref<8x96xf32, #tpu.memory_space<vmem>>, vector<8x4xf32>
    %c0_60 = arith.constant 0 : index
    %c48 = arith.constant 48 : index
    %129 = vector.load %arg9[%c0_60, %c48] : memref<8x96xf32, #tpu.memory_space<vmem>>, vector<8x4xf32>
    %c0_61 = arith.constant 0 : index
    %c80 = arith.constant 80 : index
    %130 = vector.load %arg9[%c0_61, %c80] : memref<8x96xf32, #tpu.memory_space<vmem>>, vector<8x4xf32>
    %cst_62 = arith.constant dense<0.000000e+00> : vector<8x8xf32>
    %131 = tpu.matmul %128, %129, %cst_62 {dimension_numbers = #tpu.dot_dimension_numbers<[1], [1], [0], [0], [0, 0, 1, 0], [], []>} : vector<8x4xf32>, vector<8x4xf32>, vector<8x8xf32> -> vector<8x8xf32>
    %cst_63 = arith.constant dense<0xFF800000> : vector<8xf32>
    %132 = vector.multi_reduction <maximumf>, %131, %cst_63 [1] : vector<8x8xf32> to vector<8xf32>
    %133 = vector.shape_cast %132 : vector<8xf32> to vector<8x1xf32>
    %134 = vector.extract_strided_slice %9 {offsets = [0, 16], sizes = [4, 4], strides = [1, 1]} : vector<4x32xf32> to vector<4x4xf32>
    %cst_64 = arith.constant dense<0.000000e+00> : vector<8x4xf32>
    %135 = tpu.matmul %128, %134, %cst_64 {dimension_numbers = #tpu.dot_dimension_numbers<[1], [1], [0], [0], [0, 0, 1, 0], [], []>} : vector<8x4xf32>, vector<4x4xf32>, vector<8x4xf32> -> vector<8x4xf32>
    %cst_65 = arith.constant dense<0xFF800000> : vector<8xf32>
    %136 = vector.multi_reduction <maximumf>, %135, %cst_65 [1] : vector<8x4xf32> to vector<8xf32>
    %137 = vector.shape_cast %136 : vector<8xf32> to vector<8x1xf32>
    %138 = arith.maximumf %133, %137 : vector<8x1xf32>
    %139 = vector.broadcast %138 : vector<8x1xf32> to vector<8x8xf32>
    %140 = arith.subf %131, %139 : vector<8x8xf32>
    %141 = math.exp %140 : vector<8x8xf32>
    %cst_66 = arith.constant dense<0.000000e+00> : vector<8xf32>
    %142 = vector.multi_reduction <add>, %141, %cst_66 [1] : vector<8x8xf32> to vector<8xf32>
    %143 = vector.shape_cast %142 : vector<8xf32> to vector<8x1xf32>
    %cst_67 = arith.constant dense<0.000000e+00> : vector<8x4xf32>
    %144 = tpu.matmul %141, %130, %cst_67 {dimension_numbers = #tpu.dot_dimension_numbers<[1], [0], [0], [1], [0, 0, 1, 1], [], []>} : vector<8x8xf32>, vector<8x4xf32>, vector<8x4xf32> -> vector<8x4xf32>
    %145 = vector.broadcast %138 : vector<8x1xf32> to vector<8x4xf32>
    %146 = arith.subf %135, %145 : vector<8x4xf32>
    %147 = math.exp %146 : vector<8x4xf32>
    %cst_68 = arith.constant dense<0.000000e+00> : vector<8xf32>
    %148 = vector.multi_reduction <add>, %147, %cst_68 [1] : vector<8x4xf32> to vector<8xf32>
    %149 = vector.shape_cast %148 : vector<8xf32> to vector<8x1xf32>
    %150 = arith.addf %143, %149 : vector<8x1xf32>
    %151 = vector.extract_strided_slice %11 {offsets = [0, 16], sizes = [4, 4], strides = [1, 1]} : vector<4x32xf32> to vector<4x4xf32>
    %cst_69 = arith.constant dense<0.000000e+00> : vector<8x4xf32>
    %152 = tpu.matmul %147, %151, %cst_69 {dimension_numbers = #tpu.dot_dimension_numbers<[1], [0], [0], [1], [0, 0, 1, 1], [], []>} : vector<8x4xf32>, vector<4x4xf32>, vector<8x4xf32> -> vector<8x4xf32>
    %153 = arith.addf %144, %152 : vector<8x4xf32>
    %154 = tpu.reciprocal %150 {approx = true} : vector<8x1xf32> -> vector<8x1xf32>
    %155 = vector.broadcast %154 : vector<8x1xf32> to vector<8x4xf32>
    %156 = arith.mulf %153, %155 : vector<8x4xf32>
    %c0_70 = arith.constant 0 : index
    %c20 = arith.constant 20 : index
    %157 = vector.load %arg9[%c0_70, %c20] : memref<8x96xf32, #tpu.memory_space<vmem>>, vector<8x4xf32>
    %c0_71 = arith.constant 0 : index
    %c52 = arith.constant 52 : index
    %158 = vector.load %arg9[%c0_71, %c52] : memref<8x96xf32, #tpu.memory_space<vmem>>, vector<8x4xf32>
    %c0_72 = arith.constant 0 : index
    %c84 = arith.constant 84 : index
    %159 = vector.load %arg9[%c0_72, %c84] : memref<8x96xf32, #tpu.memory_space<vmem>>, vector<8x4xf32>
    %cst_73 = arith.constant dense<0.000000e+00> : vector<8x8xf32>
    %160 = tpu.matmul %157, %158, %cst_73 {dimension_numbers = #tpu.dot_dimension_numbers<[1], [1], [0], [0], [0, 0, 1, 0], [], []>} : vector<8x4xf32>, vector<8x4xf32>, vector<8x8xf32> -> vector<8x8xf32>
    %cst_74 = arith.constant dense<0xFF800000> : vector<8xf32>
    %161 = vector.multi_reduction <maximumf>, %160, %cst_74 [1] : vector<8x8xf32> to vector<8xf32>
    %162 = vector.shape_cast %161 : vector<8xf32> to vector<8x1xf32>
    %163 = vector.extract_strided_slice %9 {offsets = [0, 20], sizes = [4, 4], strides = [1, 1]} : vector<4x32xf32> to vector<4x4xf32>
    %cst_75 = arith.constant dense<0.000000e+00> : vector<8x4xf32>
    %164 = tpu.matmul %157, %163, %cst_75 {dimension_numbers = #tpu.dot_dimension_numbers<[1], [1], [0], [0], [0, 0, 1, 0], [], []>} : vector<8x4xf32>, vector<4x4xf32>, vector<8x4xf32> -> vector<8x4xf32>
    %cst_76 = arith.constant dense<0xFF800000> : vector<8xf32>
    %165 = vector.multi_reduction <maximumf>, %164, %cst_76 [1] : vector<8x4xf32> to vector<8xf32>
    %166 = vector.shape_cast %165 : vector<8xf32> to vector<8x1xf32>
    %167 = arith.maximumf %162, %166 : vector<8x1xf32>
    %168 = vector.broadcast %167 : vector<8x1xf32> to vector<8x8xf32>
    %169 = arith.subf %160, %168 : vector<8x8xf32>
    %170 = math.exp %169 : vector<8x8xf32>
    %cst_77 = arith.constant dense<0.000000e+00> : vector<8xf32>
    %171 = vector.multi_reduction <add>, %170, %cst_77 [1] : vector<8x8xf32> to vector<8xf32>
    %172 = vector.shape_cast %171 : vector<8xf32> to vector<8x1xf32>
    %cst_78 = arith.constant dense<0.000000e+00> : vector<8x4xf32>
    %173 = tpu.matmul %170, %159, %cst_78 {dimension_numbers = #tpu.dot_dimension_numbers<[1], [0], [0], [1], [0, 0, 1, 1], [], []>} : vector<8x8xf32>, vector<8x4xf32>, vector<8x4xf32> -> vector<8x4xf32>
    %174 = vector.broadcast %167 : vector<8x1xf32> to vector<8x4xf32>
    %175 = arith.subf %164, %174 : vector<8x4xf32>
    %176 = math.exp %175 : vector<8x4xf32>
    %cst_79 = arith.constant dense<0.000000e+00> : vector<8xf32>
    %177 = vector.multi_reduction <add>, %176, %cst_79 [1] : vector<8x4xf32> to vector<8xf32>
    %178 = vector.shape_cast %177 : vector<8xf32> to vector<8x1xf32>
    %179 = arith.addf %172, %178 : vector<8x1xf32>
    %180 = vector.extract_strided_slice %11 {offsets = [0, 20], sizes = [4, 4], strides = [1, 1]} : vector<4x32xf32> to vector<4x4xf32>
    %cst_80 = arith.constant dense<0.000000e+00> : vector<8x4xf32>
    %181 = tpu.matmul %176, %180, %cst_80 {dimension_numbers = #tpu.dot_dimension_numbers<[1], [0], [0], [1], [0, 0, 1, 1], [], []>} : vector<8x4xf32>, vector<4x4xf32>, vector<8x4xf32> -> vector<8x4xf32>
    %182 = arith.addf %173, %181 : vector<8x4xf32>
    %183 = tpu.reciprocal %179 {approx = true} : vector<8x1xf32> -> vector<8x1xf32>
    %184 = vector.broadcast %183 : vector<8x1xf32> to vector<8x4xf32>
    %185 = arith.mulf %182, %184 : vector<8x4xf32>
    %c0_81 = arith.constant 0 : index
    %c24 = arith.constant 24 : index
    %186 = vector.load %arg9[%c0_81, %c24] : memref<8x96xf32, #tpu.memory_space<vmem>>, vector<8x4xf32>
    %c0_82 = arith.constant 0 : index
    %c56 = arith.constant 56 : index
    %187 = vector.load %arg9[%c0_82, %c56] : memref<8x96xf32, #tpu.memory_space<vmem>>, vector<8x4xf32>
    %c0_83 = arith.constant 0 : index
    %c88 = arith.constant 88 : index
    %188 = vector.load %arg9[%c0_83, %c88] : memref<8x96xf32, #tpu.memory_space<vmem>>, vector<8x4xf32>
    %cst_84 = arith.constant dense<0.000000e+00> : vector<8x8xf32>
    %189 = tpu.matmul %186, %187, %cst_84 {dimension_numbers = #tpu.dot_dimension_numbers<[1], [1], [0], [0], [0, 0, 1, 0], [], []>} : vector<8x4xf32>, vector<8x4xf32>, vector<8x8xf32> -> vector<8x8xf32>
    %cst_85 = arith.constant dense<0xFF800000> : vector<8xf32>
    %190 = vector.multi_reduction <maximumf>, %189, %cst_85 [1] : vector<8x8xf32> to vector<8xf32>
    %191 = vector.shape_cast %190 : vector<8xf32> to vector<8x1xf32>
    %192 = vector.extract_strided_slice %9 {offsets = [0, 24], sizes = [4, 4], strides = [1, 1]} : vector<4x32xf32> to vector<4x4xf32>
    %cst_86 = arith.constant dense<0.000000e+00> : vector<8x4xf32>
    %193 = tpu.matmul %186, %192, %cst_86 {dimension_numbers = #tpu.dot_dimension_numbers<[1], [1], [0], [0], [0, 0, 1, 0], [], []>} : vector<8x4xf32>, vector<4x4xf32>, vector<8x4xf32> -> vector<8x4xf32>
    %cst_87 = arith.constant dense<0xFF800000> : vector<8xf32>
    %194 = vector.multi_reduction <maximumf>, %193, %cst_87 [1] : vector<8x4xf32> to vector<8xf32>
    %195 = vector.shape_cast %194 : vector<8xf32> to vector<8x1xf32>
    %196 = arith.maximumf %191, %195 : vector<8x1xf32>
    %197 = vector.broadcast %196 : vector<8x1xf32> to vector<8x8xf32>
    %198 = arith.subf %189, %197 : vector<8x8xf32>
    %199 = math.exp %198 : vector<8x8xf32>
    %cst_88 = arith.constant dense<0.000000e+00> : vector<8xf32>
    %200 = vector.multi_reduction <add>, %199, %cst_88 [1] : vector<8x8xf32> to vector<8xf32>
    %201 = vector.shape_cast %200 : vector<8xf32> to vector<8x1xf32>
    %cst_89 = arith.constant dense<0.000000e+00> : vector<8x4xf32>
    %202 = tpu.matmul %199, %188, %cst_89 {dimension_numbers = #tpu.dot_dimension_numbers<[1], [0], [0], [1], [0, 0, 1, 1], [], []>} : vector<8x8xf32>, vector<8x4xf32>, vector<8x4xf32> -> vector<8x4xf32>
    %203 = vector.broadcast %196 : vector<8x1xf32> to vector<8x4xf32>
    %204 = arith.subf %193, %203 : vector<8x4xf32>
    %205 = math.exp %204 : vector<8x4xf32>
    %cst_90 = arith.constant dense<0.000000e+00> : vector<8xf32>
    %206 = vector.multi_reduction <add>, %205, %cst_90 [1] : vector<8x4xf32> to vector<8xf32>
    %207 = vector.shape_cast %206 : vector<8xf32> to vector<8x1xf32>
    %208 = arith.addf %201, %207 : vector<8x1xf32>
    %209 = vector.extract_strided_slice %11 {offsets = [0, 24], sizes = [4, 4], strides = [1, 1]} : vector<4x32xf32> to vector<4x4xf32>
    %cst_91 = arith.constant dense<0.000000e+00> : vector<8x4xf32>
    %210 = tpu.matmul %205, %209, %cst_91 {dimension_numbers = #tpu.dot_dimension_numbers<[1], [0], [0], [1], [0, 0, 1, 1], [], []>} : vector<8x4xf32>, vector<4x4xf32>, vector<8x4xf32> -> vector<8x4xf32>
    %211 = arith.addf %202, %210 : vector<8x4xf32>
    %212 = tpu.reciprocal %208 {approx = true} : vector<8x1xf32> -> vector<8x1xf32>
    %213 = vector.broadcast %212 : vector<8x1xf32> to vector<8x4xf32>
    %214 = arith.mulf %211, %213 : vector<8x4xf32>
    %c0_92 = arith.constant 0 : index
    %c28 = arith.constant 28 : index
    %215 = vector.load %arg9[%c0_92, %c28] : memref<8x96xf32, #tpu.memory_space<vmem>>, vector<8x4xf32>
    %c0_93 = arith.constant 0 : index
    %c60 = arith.constant 60 : index
    %216 = vector.load %arg9[%c0_93, %c60] : memref<8x96xf32, #tpu.memory_space<vmem>>, vector<8x4xf32>
    %c0_94 = arith.constant 0 : index
    %c92 = arith.constant 92 : index
    %217 = vector.load %arg9[%c0_94, %c92] : memref<8x96xf32, #tpu.memory_space<vmem>>, vector<8x4xf32>
    %cst_95 = arith.constant dense<0.000000e+00> : vector<8x8xf32>
    %218 = tpu.matmul %215, %216, %cst_95 {dimension_numbers = #tpu.dot_dimension_numbers<[1], [1], [0], [0], [0, 0, 1, 0], [], []>} : vector<8x4xf32>, vector<8x4xf32>, vector<8x8xf32> -> vector<8x8xf32>
    %cst_96 = arith.constant dense<0xFF800000> : vector<8xf32>
    %219 = vector.multi_reduction <maximumf>, %218, %cst_96 [1] : vector<8x8xf32> to vector<8xf32>
    %220 = vector.shape_cast %219 : vector<8xf32> to vector<8x1xf32>
    %221 = vector.extract_strided_slice %9 {offsets = [0, 28], sizes = [4, 4], strides = [1, 1]} : vector<4x32xf32> to vector<4x4xf32>
    %cst_97 = arith.constant dense<0.000000e+00> : vector<8x4xf32>
    %222 = tpu.matmul %215, %221, %cst_97 {dimension_numbers = #tpu.dot_dimension_numbers<[1], [1], [0], [0], [0, 0, 1, 0], [], []>} : vector<8x4xf32>, vector<4x4xf32>, vector<8x4xf32> -> vector<8x4xf32>
    %cst_98 = arith.constant dense<0xFF800000> : vector<8xf32>
    %223 = vector.multi_reduction <maximumf>, %222, %cst_98 [1] : vector<8x4xf32> to vector<8xf32>
    %224 = vector.shape_cast %223 : vector<8xf32> to vector<8x1xf32>
    %225 = arith.maximumf %220, %224 : vector<8x1xf32>
    %226 = vector.broadcast %225 : vector<8x1xf32> to vector<8x8xf32>
    %227 = arith.subf %218, %226 : vector<8x8xf32>
    %228 = math.exp %227 : vector<8x8xf32>
    %cst_99 = arith.constant dense<0.000000e+00> : vector<8xf32>
    %229 = vector.multi_reduction <add>, %228, %cst_99 [1] : vector<8x8xf32> to vector<8xf32>
    %230 = vector.shape_cast %229 : vector<8xf32> to vector<8x1xf32>
    %cst_100 = arith.constant dense<0.000000e+00> : vector<8x4xf32>
    %231 = tpu.matmul %228, %217, %cst_100 {dimension_numbers = #tpu.dot_dimension_numbers<[1], [0], [0], [1], [0, 0, 1, 1], [], []>} : vector<8x8xf32>, vector<8x4xf32>, vector<8x4xf32> -> vector<8x4xf32>
    %232 = vector.broadcast %225 : vector<8x1xf32> to vector<8x4xf32>
    %233 = arith.subf %222, %232 : vector<8x4xf32>
    %234 = math.exp %233 : vector<8x4xf32>
    %cst_101 = arith.constant dense<0.000000e+00> : vector<8xf32>
    %235 = vector.multi_reduction <add>, %234, %cst_101 [1] : vector<8x4xf32> to vector<8xf32>
    %236 = vector.shape_cast %235 : vector<8xf32> to vector<8x1xf32>
    %237 = arith.addf %230, %236 : vector<8x1xf32>
    %238 = vector.extract_strided_slice %11 {offsets = [0, 28], sizes = [4, 4], strides = [1, 1]} : vector<4x32xf32> to vector<4x4xf32>
    %cst_102 = arith.constant dense<0.000000e+00> : vector<8x4xf32>
    %239 = tpu.matmul %234, %238, %cst_102 {dimension_numbers = #tpu.dot_dimension_numbers<[1], [0], [0], [1], [0, 0, 1, 1], [], []>} : vector<8x4xf32>, vector<4x4xf32>, vector<8x4xf32> -> vector<8x4xf32>
    %240 = arith.addf %231, %239 : vector<8x4xf32>
    %241 = tpu.reciprocal %237 {approx = true} : vector<8x1xf32> -> vector<8x1xf32>
    %242 = vector.broadcast %241 : vector<8x1xf32> to vector<8x4xf32>
    %243 = arith.mulf %240, %242 : vector<8x4xf32>
    %244 = tpu.concatenate %40, %69, %98, %127, %156, %185, %214, %243 in 1 : vector<8x4xf32>, vector<8x4xf32>, vector<8x4xf32>, vector<8x4xf32>, vector<8x4xf32>, vector<8x4xf32>, vector<8x4xf32>, vector<8x4xf32> -> vector<8x32xf32>
    %c0_103 = arith.constant 0 : index
    %c0_104 = arith.constant 0 : index
    %245 = vector.load %arg6[%c0_103, %c0_104] : memref<32x32xf32, #tpu.memory_space<vmem>>, vector<32x32xf32>
    %cst_105 = arith.constant dense<0.000000e+00> : vector<8x32xf32>
    %246 = tpu.matmul %244, %245, %cst_105 {dimension_numbers = #tpu.dot_dimension_numbers<[1], [0], [0], [1], [0, 0, 1, 1], [], []>} : vector<8x32xf32>, vector<32x32xf32>, vector<8x32xf32> -> vector<8x32xf32>
    %c0_106 = arith.constant 0 : index
    %c0_107 = arith.constant 0 : index
    %247 = vector.load %arg7[%c0_106, %c0_107] : memref<1x32xf32, #tpu.memory_space<vmem>>, vector<1x32xf32>
    %248 = vector.broadcast %247 : vector<1x32xf32> to vector<8x32xf32>
    %249 = arith.addf %246, %248 : vector<8x32xf32>
    %c0_108 = arith.constant 0 : index
    %c0_109 = arith.constant 0 : index
    %c0_110 = arith.constant 0 : index
    %250 = vector.load %arg8[%c0_108, %c0_109, %c0_110] : memref<1x8x32xf32, #tpu.memory_space<vmem>>, vector<1x8x32xf32>
    %251 = vector.shape_cast %250 : vector<1x8x32xf32> to vector<8x32xf32>
    %252 = vector.shape_cast %249 : vector<8x32xf32> to vector<1x8x32xf32>
    tpu.vector_store %arg8[%c0_108, %c0_109, %c0_110], %252 {strides = array<i32>} : memref<1x8x32xf32, #tpu.memory_space<vmem>>, vector<1x8x32xf32>,
    return
  }
  func.func @transform_0(%arg0: i32) -> (i32, i32, i32) {
    %c0_i32 = arith.constant 0 : i32
    %c0_i32_0 = arith.constant 0 : i32
    %c0_i32_1 = arith.constant 0 : i32
    return %arg0, %c0_i32, %c0_i32_0 : i32, i32, i32
  }
  func.func @transform_1(%arg0: i32) -> (i32, i32, i32) {
    %c0_i32 = arith.constant 0 : i32
    %c0_i32_0 = arith.constant 0 : i32
    %c0_i32_1 = arith.constant 0 : i32
    return %arg0, %c0_i32, %c0_i32_0 : i32, i32, i32
  }
  func.func @transform_2(%arg0: i32) -> (i32, i32, i32) {
    %c0_i32 = arith.constant 0 : i32
    %c0_i32_0 = arith.constant 0 : i32
    %c0_i32_1 = arith.constant 0 : i32
    return %arg0, %c0_i32, %c0_i32_0 : i32, i32, i32
  }
  func.func @transform_3(%arg0: i32) -> (i32, i32) {
    %c0_i32 = arith.constant 0 : i32
    %c0_i32_0 = arith.constant 0 : i32
    %c0_i32_1 = arith.constant 0 : i32
    return %c0_i32, %c0_i32_0 : i32, i32
  }
  func.func @transform_4(%arg0: i32) -> (i32, i32) {
    %c0_i32 = arith.constant 0 : i32
    %c0_i32_0 = arith.constant 0 : i32
    %c0_i32_1 = arith.constant 0 : i32
    return %c0_i32, %c0_i32_0 : i32, i32
  }
  func.func @transform_5(%arg0: i32) -> (i32, i32) {
    %c0_i32 = arith.constant 0 : i32
    %c0_i32_0 = arith.constant 0 : i32
    %c0_i32_1 = arith.constant 0 : i32
    return %c0_i32, %c0_i32_0 : i32, i32
  }
  func.func @transform_6(%arg0: i32) -> (i32, i32) {
    %c0_i32 = arith.constant 0 : i32
    %c0_i32_0 = arith.constant 0 : i32
    %c0_i32_1 = arith.constant 0 : i32
    return %c0_i32, %c0_i32_0 : i32, i32
  }
  func.func @transform_7(%arg0: i32) -> (i32, i32, i32) {
    %c0_i32 = arith.constant 0 : i32
    %c0_i32_0 = arith.constant 0 : i32
    %c0_i32_1 = arith.constant 0 : i32
    return %arg0, %c0_i32, %c0_i32_0 : i32, i32, i32
  }
}

</mosaic_0001>

<bundles_post_ra>
// kernel: tpu_custom_call.1
= control target key start
LH: loop header
LB: loop body
LE: loop exit
PB: predicated region body
PF: predicated region fallthrough
CT: control target
= control target key end

     0   :  { %s4759_s0 = inlined_call_operand.hbm [shape: f32[2,8,32], index: 0, kind: input, shape index: {}]   ;;  %s4760_s1 = inlined_call_operand.hbm [shape: f32[2,4,32], index: 1, kind: input, shape index: {}]   ;;  %s4761_s2 = inlined_call_operand.hbm [shape: f32[2,4,32], index: 2, kind: input, shape index: {}]   ;;  %s4762_s3 = inlined_call_operand.hbm [shape: f32[32,96], index: 3, kind: input, shape index: {}]   ;;  %s4763_s4 = inlined_call_operand.vmem [shape: f32[1,96], index: 4, kind: input, shape index: {}]   ;;  %s4764_s5 = inlined_call_operand.hbm [shape: f32[32,32], index: 5, kind: input, shape index: {}]   ;;  %s4765_s6 = inlined_call_operand.vmem [shape: f32[1,32], index: 6, kind: input, shape index: {}]   ;;  %s4766_s7 = inlined_call_operand.hbm [shape: f32[2,8,32], index: 7, kind: output, shape index: {}]  }
   0x1   :  { %4784 = sst [smem:[#allocation22_spill]] %s4760_s1 }
   0x2   :  { %4785 = sst [smem:[#allocation23_spill]] %s4762_s3 }
   0x3   :  { %4786 = sst [smem:[#allocation24_spill]] %s4766_s7 }
   0x4   :  { %12 = vsyncpa [#allocation4], 0 }
   0x5   :  { %14 = vsyncpa [#allocation4 + $0x1], 0 }
   0x6   :  { %15 = vsyncpa [#allocation7], 0 }
   0x7   :  { %17 = vsyncpa [#allocation7 + $0x1], 0 }
   0x8   :  { %18 = vsyncpa [#allocation10], 0 }
   0x9   :  { %19 = vsyncpa [#allocation5], 0 }
   0xa   :  { %21 = vsyncpa [#allocation5 + $0x1], 0  ;;  %s4159_s24 = smov 0   ;;  %s4161_s25 = smov 0  }
   0xb   :  { %s4163_s26 = smov 0   ;;  %s4165_s27 = smov 0  }
   0xc LB: > { %4787 = sst [smem:[#allocation17_spill]] %s4065_s24  ;;  %s4180_s28 = sadd.s32 4294967295, %s4077_s27   ;;  %s4077_s27 = sphi %s4165_s27, %s4817_s27   ;;  %s4073_s26 = sphi %s4163_s26, %s4819_s26   ;;  %s4069_s25 = sphi %s4161_s25, %s4821_s25   ;;  %s4065_s24 = sphi %s4159_s24, %s4820_s24  }
   0xd   : > { %4788 = sst [smem:[#allocation18_spill]] %s4073_s26  ;;  %s3372_s29 = sadd.s32 4294967294, %s4077_s27  }
   0xe   : > { %p47_p0 = scmp.ne.s32.totalorder %s4069_s25, %s4065_s24  ;;  %p4771_p1 = scmp.eq.s32.totalorder %s4180_s28, 0 }
   0xf   : > { %p207_p2 = scmp.eq.s32.totalorder %s4180_s28, 1  ;;  %p213_p3 = scmp.eq.s32.totalorder %s3372_s29, 1 }
  0x10   : > { %p4189_p4 = por %p4771_p1, %p47_p0  ;;  %p3373_p5 = scmp.ge.s32.totalorder %s4077_s27, 1 }
  0x11   : > { %p4194_p6 = por %p213_p3, %p47_p0  ;;  %p220_p7 = scmp.lt.s32.totalorder %s4077_s27, 3 }
  0x12   : > { %s4789_s30 = scalar_select %p4189_p4, 1, 0 }
  0x13   : > { %s4790_s8 = scalar_select %p4194_p6, 1, 0 }
  0x14   : > { %p4199_p8 = pnand %p3373_p5, %p220_p7  ;;  %s4079_s10 = smov [#allocation9]  }
  0x15   : > { %4791 = sst [smem:[#allocation19_spill]] %s4790_s8  ;;  %s232_s11 = sshll.u32 %s4079_s10, 4  ;;  %s233_s11 = int_to_ptr.vmem [resolvable:$true] %s232_s11 }
  0x16   : > { %s4792_s9 = scalar_select %p4199_p8, 1, 0 }
  0x17   : > { %p3726_p9 = pneg %p4199_p8  ;;  %s4213_s13 = sadd.s32 1, %s4077_s27  }
  0x18   : > { %4794 = sst [smem:[#allocation20_spill]] %s4213_s13  ;;  %s34_s14 = sadd.s32 1, %s4073_s26 }
  0x19   : > { %p4208_p11 = pnand %p3726_p9, %p4771_p1  ;;  %s31_s15 = ssub.s32 %s4077_s27, %s4213_s13 }
  0x1a   : > { %s3880_s16 = scalar_lea.vmem %s233_s11, 512  ;;  %p3888_p5 = scmp.lt.s32.totalorder %s233_s11, %s233_s11 }
  0x1b   : > { %s4793_s12 = scalar_select %p4208_p11, 1, 0 }
  0x1c   : > { %p4772_p12 = pneg %p4208_p11  ;;  %p3881_p13 = scmp.ne.s32.totalorder %s233_s11, %s3880_s16 }
  0x1d   : > { %p3889_p7 = scmp.lt.s32.totalorder %s3880_s16, %s3880_s16 }
  0x1e   : > { %p3883_p0 = pnand %p3881_p13, %p4772_p12 }
  0x1f   : > { %p3890_p9 = por %p3889_p7, %p3888_p5 }
  0x20   : > { %p3884_p3 = pneg %p3883_p0 }
  0x22   : > { %p3891_p10 = pnand %p3890_p9, %p3884_p3 }
  0x24   : > { %3894 = shalt.err (!%p3891_p10)
}
  0x25   : > { %s4767_s17 = smov 128   ;;  %s4768_s18 = smov 8  }
  0x26   : > { %s4795_s3 = sld [smem:[#allocation23_spill]]  ;;  %p32_p10 = scmp.eq.s32.totalorder %s31_s15, 0 }
  0x27   : > { %p41_p13 = scmp.ne.s32.totalorder %s4073_s26, %s4069_s25  ;;  %p42_p0 = scmp.eq.s32.totalorder %s4077_s27, 0 }
  0x28   : > { %p3749_p3 = scmp.lt.s32.totalorder %s4077_s27, 2  ;;  %s4245_s23 = sand.u32 1, %s4073_s26  }
  0x29   : > { %s4236_s21 = scalar_select %p32_p10, %s4073_s26, %s34_s14  }
  0x2a   : > { %p43_p5 = por %p42_p0, %p41_p13  ;;  %p4240_p7 = por %p207_p2, %p41_p13 }
  0x2b   : > { %4796 = sst [smem:[#allocation21_spill]] %s4236_s21  ;;  %s283_s29 = sand.u32 1, %s4077_s27  }
  0x2c   : > { %3729 = dma.hbm_to_vmem [thread:$0]  (!%p4208_p11), %s4795_s3, 512, %s233_s11, [#allocation10], %s4767_s17, %s4767_s17, %s4768_s18  }
  0x2d   : > { %s4797_s22 = scalar_select %p4240_p7, 1, 0 }
  0x2e   : > { %p4248_p9 = pnand %p3749_p3, %p43_p5  ;;  %s4770_s11 = sshll.u32 %s4245_s23, 2 }
  0x2f   : > { %s4769_s15 = sshll.u32 %s4077_s27, 6  ;;  %s4799_s1 = sld [smem:[#allocation22_spill]] }
  0x30   : > { %s287_s20 = scalar_lea.vmem [#allocation6], %s4770_s11  ;;  %s4263_s18 = scalar_lea.sflag [#allocation7], %s283_s29 }
  0x31   : > { %s294_s17 = sshll.u32 %s287_s20, 4  ;;  %p4269_p10 = pneg %p4248_p9  ;;  %s295_s17 = int_to_ptr.vmem [resolvable:$true] %s294_s17 }
  0x35   : > { %s4259_s19 = scalar_lea.hbm %s4799_s1, %s4769_s15  ;;  %s3900_s15 = scalar_lea.hbm %s4799_s1, 128 }
  0x36   : > { %s3895_s3 = scalar_lea.hbm %s4259_s19, 64  ;;  %p3901_p3 = scmp.lt.s32.totalorder %s4259_s19, %s4799_s1 }
  0x37   : > { %p3896_p2 = scmp.ne.s32.totalorder %s4259_s19, %s3895_s3  ;;  %p3902_p5 = scmp.lt.s32.totalorder %s3900_s15, %s3895_s3 }
  0x39   : > { %p3898_p13 = pnand %p4269_p10, %p3896_p2  ;;  %p3903_p1 = por %p3902_p5, %p3901_p3 }
  0x3b   : > { %p3899_p0 = pneg %p3898_p13 }
  0x3d   : > { %p3904_p12 = pnand %p3903_p1, %p3899_p0 }
  0x3f   : > { %3907 = shalt.err (!%p3904_p12)
}
  0x40   : > { %s3908_s29 = scalar_lea.vmem %s295_s17, 64  ;;  %s4082_s26 = smov [#allocation6]  }
  0x41   : > { %p3909_p6 = scmp.ne.s32.totalorder %s295_s17, %s3908_s29  ;;  %s3913_s13 = sshll.u32 %s4082_s26, 4  ;;  %s3914_s13 = int_to_ptr.vmem [resolvable:$false] %s3913_s13 }
  0x42   : > { %s3915_s8 = scalar_lea.vmem %s3914_s13, 128  ;;  %p3916_p2 = scmp.lt.s32.totalorder %s295_s17, %s3914_s13 }
  0x43   : > { %p3911_p7 = pnand %p3909_p6, %p4269_p10  ;;  %p3917_p13 = scmp.lt.s32.totalorder %s3915_s8, %s3908_s29 }
  0x45   : > { %p3912_p4 = pneg %p3911_p7  ;;  %p3918_p8 = por %p3917_p13, %p3916_p2 }
  0x47   : > { %p3919_p11 = pnand %p3918_p8, %p3912_p4 }
  0x49   : > { %3922 = shalt.err (!%p3919_p11)
}
  0x4a   : > { %3739 = dma.hbm_to_vmem [thread:$0]  (!%p4248_p9), %s4259_s19, 64, %s295_s17, %s4263_s18  }
  0x4b   : > { %s4801_s3 = sshll.u32 %s4077_s27, 6  ;;  %s4083_s14 = smov [#allocation11]  }
  0x4c   : > { %s4293_s26 = scalar_lea.hbm %s4761_s2, %s4801_s3  ;;  %s248_s13 = sshll.u32 %s4083_s14, 4  ;;  %s249_s13 = int_to_ptr.vmem [resolvable:$true] %s248_s13 }
  0x4d   : > { %s3377_s8 = sshll.u32 %s4245_s23, 3  ;;  %s3934_s16 = scalar_lea.vmem %s249_s13, 512 }
  0x4e   : > { %p3935_p1 = scmp.ne.s32.totalorder %s249_s13, %s3934_s16  ;;  %p4802_p4 = scmp.ne.s32.totalorder %s4793_s12, 0 }
  0x4f   : > { %p3942_p12 = scmp.lt.s32.totalorder %s249_s13, %s249_s13  ;;  %p3943_p7 = scmp.lt.s32.totalorder %s3934_s16, %s3934_s16 }
  0x50   : > { %p4803_p6 = pneg %p4802_p4 }
  0x51   : > { %p3944_p0 = por %p3943_p7, %p3942_p12 }
  0x52   : > { %p3937_p8 = pnand %p3935_p1, %p4803_p6 }
  0x54   : > { %p3938_p11 = pneg %p3937_p8 }
  0x56   : > { %p3945_p3 = pnand %p3944_p0, %p3938_p11 }
  0x58   : > { %3948 = shalt.err (!%p3945_p3)
}
  0x59   : > { %s4804_s17 = smov 8   ;;  %s4805_s19 = smov 128  }
  0x5a   : > { %3732 = dma.hbm_to_vmem [thread:$0]  (!%p4802_p4), %s4764_s5, 512, %s249_s13, [#allocation10], %s4805_s19, %s4805_s19, %s4804_s17  }
  0x5b   : > { %s3378_s3 = sshll.u32 %s4077_s27, 7  ;;  %s269_s12 = scalar_lea.vmem [#allocation3], %s3377_s8 }
  0x5c   : > { %s4311_s14 = scalar_lea.hbm %s4759_s0, %s3378_s3  ;;  %s276_s16 = sshll.u32 %s269_s12, 4  ;;  %s277_s16 = int_to_ptr.vmem [resolvable:$true] %s276_s16 }
  0x5d   : > { %s4806_s1 = sshll.u32 %s4245_s23, 2  ;;  %s266_s29 = scalar_lea.sflag [#allocation4], %s4245_s23 }
  0x5e   : > { %s305_s24 = scalar_lea.vmem [#allocation8], %s4806_s1  ;;  %s3949_s7 = scalar_lea.hbm %s4311_s14, 128 }
  0x5f   : > { %s312_s20 = sshll.u32 %s305_s24, 4  ;;  %p3950_p5 = scmp.ne.s32.totalorder %s4311_s14, %s3949_s7  ;;  %s313_s20 = int_to_ptr.vmem [resolvable:$true] %s312_s20 }
  0x60   : > { %s3954_s19 = scalar_lea.hbm %s4759_s0, 256  ;;  %p3955_p1 = scmp.lt.s32.totalorder %s4311_s14, %s4759_s0 }
  0x61   : > { %p3952_p2 = pnand %p3950_p5, %p4269_p10  ;;  %p3956_p4 = scmp.lt.s32.totalorder %s3954_s19, %s3949_s7 }
  0x63   : > { %p3953_p13 = pneg %p3952_p2  ;;  %p3957_p6 = por %p3956_p4, %p3955_p1 }
  0x65   : > { %p3958_p8 = pnand %p3957_p6, %p3953_p13 }
  0x67   : > { %3961 = shalt.err (!%p3958_p8)
}
  0x68   : > { %s3962_s1 = scalar_lea.vmem %s277_s16, 128  ;;  %s4084_s24 = smov [#allocation3]  }
  0x69   : > { %p3963_p11 = scmp.ne.s32.totalorder %s277_s16, %s3962_s1  ;;  %s3967_s23 = sshll.u32 %s4084_s24, 4  ;;  %s3968_s23 = int_to_ptr.vmem [resolvable:$false] %s3967_s23 }
  0x6a   : > { %s3969_s8 = scalar_lea.vmem %s3968_s23, 256  ;;  %p3970_p0 = scmp.lt.s32.totalorder %s277_s16, %s3968_s23 }
  0x6b   : > { %p3965_p12 = pnand %p3963_p11, %p4269_p10  ;;  %p3971_p3 = scmp.lt.s32.totalorder %s3969_s8, %s3962_s1 }
  0x6d   : > { %p3966_p7 = pneg %p3965_p12  ;;  %p3972_p5 = por %p3971_p3, %p3970_p0 }
  0x6f   : > { %p3973_p2 = pnand %p3972_p5, %p3966_p7 }
  0x71   : > { %3976 = shalt.err (!%p3973_p2)
}
  0x72   : > { %3736 = dma.hbm_to_vmem [thread:$0]  (!%p4248_p9), %s4311_s14, 128, %s277_s16, %s266_s29  }
  0x73   : > { %s3977_s7 = scalar_lea.hbm %s4293_s26, 64  ;;  %s3982_s13 = scalar_lea.hbm %s4761_s2, 128 }
  0x74   : > { %p3978_p13 = scmp.ne.s32.totalorder %s4293_s26, %s3977_s7  ;;  %p3983_p6 = scmp.lt.s32.totalorder %s4293_s26, %s4761_s2 }
  0x75   : > { %p3984_p8 = scmp.lt.s32.totalorder %s3982_s13, %s3977_s7 }
  0x76   : > { %p3980_p1 = pnand %p3978_p13, %p4269_p10 }
  0x77   : > { %p3985_p11 = por %p3984_p8, %p3983_p6 }
  0x78   : > { %p3981_p4 = pneg %p3980_p1 }
  0x7a   : > { %p3986_p12 = pnand %p3985_p11, %p3981_p4 }
  0x7c   : > { %3989 = shalt.err (!%p3986_p12)
}
  0x7d   : > { %s3990_s3 = scalar_lea.vmem %s313_s20, 64  ;;  %s4085_s14 = smov [#allocation8]  }
  0x7e   : > { %p3991_p7 = scmp.ne.s32.totalorder %s313_s20, %s3990_s3  ;;  %s3995_s16 = sshll.u32 %s4085_s14, 4  ;;  %s3996_s16 = int_to_ptr.vmem [resolvable:$false] %s3995_s16 }
  0x7f   : > { %s3997_s29 = scalar_lea.vmem %s3996_s16, 128  ;;  %p3998_p5 = scmp.lt.s32.totalorder %s313_s20, %s3996_s16 }
  0x80   : > { %p3993_p0 = pnand %p3991_p7, %p4269_p10  ;;  %p3999_p2 = scmp.lt.s32.totalorder %s3997_s29, %s3990_s3 }
  0x82   : > { %p3994_p3 = pneg %p3993_p0  ;;  %p4000_p13 = por %p3999_p2, %p3998_p5 }
  0x84   : > { %p4001_p1 = pnand %p4000_p13, %p3994_p3 }
  0x86   : > { %4004 = shalt.err (!%p4001_p1)
}
  0x87   : > { %3742 = dma.hbm_to_vmem [thread:$0]  (!%p4248_p9), %s4293_s26, 64, %s313_s20, %s4263_s18  }
  0x88   : > { %p4807_p4 = scmp.ne.s32.totalorder %s4792_s9, 0 }
  0x89   : > { %s4352_s21 = sand.u32 (!%p4807_p4), 1, %s4069_s25   ;;  %p4808_p10 = scmp.ne.s32.totalorder (!%p4807_p4), %s4789_s30, 0 }
  0x8a   : > { %321 = sbr.rel (%p4807_p4) target bundleno = 3861 (0xf15), region = 48  ;;  %s3384_s11 = sshll.u32 (!%p4807_p4), %s4352_s21, 3 }
  0x8b   : > { %s324_s1 = scalar_lea.sflag (!%p4807_p4), [#allocation4], %s4352_s21  ;;  %s327_s24 = scalar_lea.vmem (!%p4807_p4), [#allocation3], %s3384_s11 }
  0x8f   : > { %4048 = dma.done.wait (%p4808_p10), %s324_s1, 128  }
  0x90   : > { %4050 = vsyncadd (%p4808_p10), %s324_s1, 4294967168  ;;  %s332_s9 = sand.u32 1, %s4180_s28   ;;  %s3385_s18 = sshll.u32 %s4352_s21, 2 }
  0x91   : > { %s333_s10 = scalar_lea.sflag [#allocation7], %s332_s9  ;;  %s4364_s26 = scalar_lea.vmem [#allocation6], %s3385_s18 }
  0x92   : > { %4052 = dma.done.wait (%p4808_p10), %s333_s10, 128  }
  0x93   : > { %4054 = vsyncadd (%p4808_p10), %s333_s10, 4294967168  ;;  %s4370_s20 = scalar_lea.vmem [#allocation8], %s3385_s18  ;;  %p4809_p9 = scmp.eq.s32.totalorder %s4180_s28, 0 }
  0x95   : > { %4056 = dma.done.wait (%p4809_p9), [#allocation10], 1024   ;;  %p4810_p6 = pmov %p4809_p9 }
  0x96   : > { %v4086_v0 = vmov 0.0   ;;  %vm4087_vm0 = vmmov 0   ;;  %v398_v1 = vld [vmem:[#allocation9 + $0x18] sm:$0xff]  ;;  %v397_v2 = vld [vmem:[#allocation9 + $0x10] sm:$0xff]  ;;  %v396_v3 = vld [vmem:[#allocation9 + $0x8] sm:$0xff]  ;;  %vm406_vm1 = vcmask 261120  }
  0x97   : > { %4058 = vsyncadd (%p4810_p6), [#allocation10], 4294966272  ;;  %3528 = vmatprep.subr.mxu0 %v4086_v0  ;;  %3536 = vmatprep.mubr.msk.f32.mxu0 %vm4087_vm0, %v4086_v0  ;;  %v395_v4 = vld [vmem:[#allocation9] sm:$0xff]  ;;  %v3390_v6 = vld [vmem:[%s4763_s4] ss:$0 sm:$0xff]  ;;  %vm480_vm2 = vcmask 785408  }
  0x98   : > { %3539 = vmatprep.subr.mxu1 %v4086_v0  ;;  %3541 = vmatprep.mubr.msk.f32.mxu1 %vm4087_vm0, %v4086_v0  ;;  %v394_v5 = vld [vmem:[%s327_s24] sm:$0xff]  ;;  %s4088_s8 = smov 64   ;;  %s4089_s7 = smov 96   ;;  %vm488_vm3 = vcmask 31744   ;;  %v4400_v13 = vld [vmem:[%s4364_s26] sm:$0xf] }
  0x99   : > { %3529 = vmatpush3.msra.mxu0 %v398_v1  ;;  %s4090_s15 = smov 92   ;;  %vm563_vm4 = vcmask 64512   ;;  %v4418_v21 = vld [vmem:[%s4370_s20] sm:$0xf]  ;;  %s4091_s12 = smov 124   ;;  %vm660_vm5 = vcmask 1043456  }
  0x9a   : > { %3530 = vmatprep.subr.mxu0 %v4086_v0  ;;  %s4092_s13 = smov 60   ;;  %s4093_s17 = smov 120   ;;  %vm3131_vm6 = vcmask 97280   ;;  %vm3133_vm7 = vcmask 130048   ;;  %vm3135_vm8 = vcmask 162816   ;;  %vm3137_vm9 = vcmask 195584  }
  0x9b   : > { %3531 = vmatpush3.msra.mxu0 %v397_v2  ;;  %s4094_s19 = smov 88   ;;  %s4095_s3 = smov 56   ;;  %vm3139_vm10 = vcmask 228352  }
  0x9c   : > { %3532 = vmatprep.subr.mxu0 %v4086_v0  ;;  %s4096_s14 = smov 52   ;;  %s4097_s16 = smov 84  }
  0x9d   : > { %3533 = vmatpush3.msra.mxu0 %v396_v3  ;;  %s4098_s29 = smov 116   ;;  %s4099_s1 = smov 112  }
  0x9e   : > { %3534 = vmatprep.subr.mxu0 %v4086_v0  ;;  %s4100_s24 = smov 80   ;;  %s4101_s9 = smov 48  }
  0x9f   : > { %3535 = vmatpush3.msra.mxu0 %v395_v4  ;;  %s4102_s18 = smov 76   ;;  %s4103_s10 = smov 108  }
  0xa0   : > { %3537 = vmatmul.mubr.msk.f32.vlgmr.msra.gmra.mxu0 %vm406_vm1, %v394_v5  ;;  %3559 = vmatprep.subr.mxu0 %v4086_v0  ;;  %s4104_s26 = smov 44   ;;  %s4105_s20 = smov 104  }
  0xa1   : > { %3561 = vmatprep.mubr.msk.f32.mxu0 %vm4087_vm0, %v4086_v0  ;;  %s4106_s30 = smov 72   ;;  %s4107_s23 = smov 40  }
  0xa2   : > { %p4812_p11 = scmp.ne.s32.totalorder %s4797_s22, 0 }
 0x160   : > { %v476_v7 = vpop.f32.mrf.mxu0 }
 0x161   : > { %v477_v8 = vadd.f32 %v3390_v6, %v476_v7 }
 0x162   : > { %v3538_v9 = vpop.f32.mrf.mxu0 }
 0x163   : > { %481 = vst.msk [vmem:[#allocation2] sm:$0xff] %vm480_vm2, %v477_v8 }
 0x16a   : > { %v4392_v10 = vld [vmem:[#allocation2] sm:$0xff] }
 0x16b   : > { %734 = vrot.lane.b32.xlu1 %v4392_v10, %s4088_s8  ;;  %486 = vrot.lane.b32.xlu0 %v4392_v10, %s4089_s7  ;;  %s4108_s8 = smov 68   ;;  %s4109_s7 = smov 100  }
 0x16f   : > { %814 = vrot.lane.b32.xlu1 %v4392_v10, %s4090_s15  ;;  %s4110_s15 = smov 36  }
 0x1dd   : > { %v735_v11 = vpop.permute.xlu1 %734  ;;  %v487_v12 = vpop.permute.xlu0 %486 }
 0x1de   : > { %3540 = vmatpush3.xpose.msk.msra.mxu1 %vm488_vm3, %v487_v12 }
 0x1df   : > { %3544 = vmatprep.subr.mxu1 %v4086_v0 }
 0x1e1   : > { %v815_v14 = vpop.permute.xlu1 %814  ;;  %3542 = vmatmul.mubr.msk.f32.vlgmr.msra.gmra.mxu1 %vm488_vm3, %v4392_v10 }
 0x1e2   : > { %3545 = vmatpush3.xpose.msk.msra.mxu1 %vm488_vm3, %v4400_v13  ;;  %3560 = vmatpush3.xpose.msk.msra.mxu0 %vm488_vm3, %v815_v14 }
 0x1e3   : > { %3546 = vmatprep.mubr.msk.f32.mxu1 %vm4087_vm0, %v4086_v0  ;;  %3549 = vmatprep.subr.mxu1 %v4086_v0 }
 0x1e4   : > { %3569 = vmatprep.subr.mxu0 %v4086_v0 }
 0x1e5   : > { %3547 = vmatmul.mubr.msk.f32.vlgmr.msra.gmra.mxu1 %vm488_vm3, %v4392_v10 }
 0x1e6   : > { %3551 = vmatprep.mubr.msk.f32.mxu1 %vm4087_vm0, %v4086_v0  ;;  %3550 = vmatpush3.msk.msra.mxu1 %vm660_vm5, %v4418_v21 }
 0x1e7   : > { %3554 = vmatprep.subr.mxu1 %v4086_v0 }
 0x2a1   : > { %v559_v15 = vpop.f32.mrf.mxu1 }
 0x2a2   : > { %v564_v16 = vsel %vm563_vm4, %v559_v15, -inf }
 0x2a3   : > { %565 = vmax.xlane.f32.xlu0 %v564_v16  ;;  %v3543_v17 = vpop.f32.mrf.mxu1 }
 0x2a5   : > { %v636_v18 = vpop.f32.mrf.mxu1 }
 0x2a6   : > { %v640_v19 = vsel %vm488_vm3, %v636_v18, -inf }
 0x2a7   : > { %641 = vmax.xlane.f32.xlu1 %v640_v19  ;;  %v3548_v20 = vpop.f32.mrf.mxu1 }
 0x2b8   : > { %893 = vrot.lane.b32.xlu1 %v4400_v13, %s4091_s12 }
 0x2b9   : > { %984 = vrot.lane.b32.xlu0 %v4418_v21, %s4091_s12 }
 0x2bc   : > { %812 = vrot.lane.b32.xlu1 %v4392_v10, %s4091_s12  ;;  %s4111_s12 = smov 4  }
 0x2bd   : > { %1061 = vrot.lane.b32.xlu0 %v4392_v10, %s4092_s13  ;;  %s4112_s13 = smov 8  }
 0x32c   : > { %v566_v22 = vpop.xlane.xlu0 %565 }
 0x330   : > { %v642_v23 = vpop.xlane.xlu1 %641  ;;  %v985_v31 = vpop.permute.xlu0 %984 }
 0x331   : > { %v643_v24 = vmax.f32 %v566_v22, %v642_v23 }
 0x333   : > { %v650_v25 = vsub.f32 %v636_v18, %v643_v24  ;;  %v644_v26 = vsub.f32 %v559_v15, %v643_v24 }
 0x334   : > { %v894_v27 = vpop.permute.xlu1 %893  ;;  %v1062_v34 = vpop.permute.xlu0 %1061 }
 0x335   : > { %v651_v28 = vmul.f32 1.442695, %v650_v25  ;;  %v645_v29 = vmul.f32 1.442695, %v644_v26 }
 0x337   : > { %3821 = vpow2.f32 %v651_v28 }
 0x338   : > { %v813_v30 = vpop.permute.xlu1 %812  ;;  %3823 = vpow2.f32 %v645_v29 }
 0x339   : > { %3562 = vmatmul.mubr.msk.f32.vlgmr.msra.gmra.mxu0 %vm488_vm3, %v813_v30 }
 0x33a   : > { %3570 = vmatpush3.msk.msra.mxu0 %vm660_vm5, %v985_v31  ;;  %3571 = vmatprep.mubr.msk.f32.mxu0 %vm4087_vm0, %v4086_v0 }
 0x33b   : > { %3579 = vmatprep.subr.mxu0 %v4086_v0 }
 0x344   : > { %v4432_v32 = vpop.eup %3821 }
 0x345   : > { %3552 = vmatmul.mubr.msk.f32.vlgmr.msra.gmra.mxu1 %vm488_vm3, %v4432_v32  ;;  %v4439_v33 = vpop.eup %3823 }
 0x346   : > { %3555 = vmatpush3.msra.mxu1 %v735_v11  ;;  %3556 = vmatprep.mubr.msk.f32.mxu1 %vm4087_vm0, %v4086_v0 }
 0x347   : > { %3564 = vmatprep.subr.mxu1 %v4086_v0 }
 0x349   : > { %3557 = vmatmul.mubr.msk.f32.vlgmr.msra.gmra.mxu1 %vm563_vm4, %v4439_v33 }
 0x34a   : > { %3565 = vmatpush3.xpose.msk.msra.mxu1 %vm488_vm3, %v894_v27  ;;  %3566 = vmatprep.mubr.msk.f32.mxu1 %vm4087_vm0, %v4086_v0 }
 0x34b   : > { %3574 = vmatprep.subr.mxu1 %v4086_v0 }
 0x34d   : > { %3567 = vmatmul.mubr.msk.f32.vlgmr.msra.gmra.mxu1 %vm488_vm3, %v813_v30 }
 0x34e   : > { %3575 = vmatpush3.msra.mxu1 %v1062_v34  ;;  %3576 = vmatprep.mubr.msk.f32.mxu1 %vm4087_vm0, %v4086_v0 }
 0x34f   : > { %3584 = vmatprep.subr.mxu1 %v4086_v0 }
 0x3f9   : > { %v886_v35 = vpop.f32.mrf.mxu0 }
 0x3fa   : > { %v890_v36 = vsel %vm563_vm4, %v886_v35, -inf }
 0x3fb   : > { %891 = vmax.xlane.f32.xlu1 %v890_v36  ;;  %v3563_v37 = vpop.f32.mrf.mxu0 }
 0x405   : > { %v730_v38 = vpop.f32.mrf.mxu1 }
 0x407   : > { %v3553_v39 = vpop.f32.mrf.mxu1 }
 0x409   : > { %v806_v40 = vpop.f32.mrf.mxu1 }
 0x40a   : > { %v4452_v41 = vadd.f32 %v806_v40, %v730_v38 }
 0x40b   : > { %v3558_v42 = vpop.f32.mrf.mxu1 }
 0x40c   : > { %1139 = vrot.lane.b32.xlu1 %v4392_v10, %s4093_s17 }
 0x40d   : > { %v963_v43 = vpop.f32.mrf.mxu1 }
 0x40e   : > { %v967_v44 = vsel %vm488_vm3, %v963_v43, -inf }
 0x40f   : > { %968 = vmax.xlane.f32.xlu0 %v967_v44  ;;  %v3568_v45 = vpop.f32.mrf.mxu1 }
 0x425   : > { %1141 = vrot.lane.b32.xlu0 %v4392_v10, %s4094_s19  ;;  %s4114_s19 = smov 16  }
 0x429   : > { %1220 = vrot.lane.b32.xlu0 %v4400_v13, %s4093_s17 }
 0x42d   : > { %1311 = vrot.lane.b32.xlu0 %v4418_v21, %s4093_s17  ;;  %s4113_s17 = smov 12  }
 0x484   : > { %v892_v46 = vpop.xlane.xlu1 %891 }
 0x488   : > { %v1140_v57 = vpop.permute.xlu1 %1139 }
 0x498   : > { %v969_v47 = vpop.xlane.xlu0 %968 }
 0x499   : > { %v970_v48 = vmax.f32 %v892_v46, %v969_v47 }
 0x49b   : > { %v971_v49 = vsub.f32 %v886_v35, %v970_v48  ;;  %v977_v50 = vsub.f32 %v963_v43, %v970_v48 }
 0x49c   : > { %v1142_v53 = vpop.permute.xlu0 %1141 }
 0x49d   : > { %v972_v51 = vmul.f32 1.442695, %v971_v49  ;;  %v978_v52 = vmul.f32 1.442695, %v977_v50 }
 0x49f   : > { %3825 = vpow2.f32 %v972_v51 }
 0x4a0   : > { %3827 = vpow2.f32 %v978_v52  ;;  %v1221_v54 = vpop.permute.xlu0 %1220 }
 0x4a4   : > { %v1312_v58 = vpop.permute.xlu0 %1311 }
 0x4ac   : > { %v4459_v55 = vpop.eup %3825 }
 0x4ad   : > { %v4461_v56 = vpop.eup %3827  ;;  %3577 = vmatmul.mubr.msk.f32.vlgmr.msra.gmra.mxu1 %vm563_vm4, %v4459_v55 }
 0x4ae   : > { %3572 = vmatmul.mubr.msk.f32.vlgmr.msra.gmra.mxu0 %vm488_vm3, %v4461_v56  ;;  %3585 = vmatpush3.xpose.msk.msra.mxu1 %vm488_vm3, %v1221_v54 }
 0x4af   : > { %3580 = vmatpush3.xpose.msk.msra.mxu0 %vm488_vm3, %v1142_v53  ;;  %3581 = vmatprep.mubr.msk.f32.mxu0 %vm4087_vm0, %v4086_v0 }
 0x4b0   : > { %3586 = vmatprep.mubr.msk.f32.mxu1 %vm4087_vm0, %v4086_v0  ;;  %3589 = vmatprep.subr.mxu0 %v4086_v0 }
 0x4b1   : > { %3587 = vmatmul.mubr.msk.f32.vlgmr.msra.gmra.mxu1 %vm488_vm3, %v1140_v57  ;;  %3594 = vmatprep.subr.mxu1 %v4086_v0 }
 0x4b2   : > { %3582 = vmatmul.mubr.msk.f32.vlgmr.msra.gmra.mxu0 %vm488_vm3, %v1140_v57  ;;  %3596 = vmatprep.mubr.msk.f32.mxu1 %vm4087_vm0, %v4086_v0 }
 0x4b3   : > { %3591 = vmatprep.mubr.msk.f32.mxu0 %vm4087_vm0, %v4086_v0  ;;  %3590 = vmatpush3.msk.msra.mxu0 %vm660_vm5, %v1312_v58 }
 0x4b4   : > { %3599 = vmatprep.subr.mxu0 %v4086_v0 }
 0x56d   : > { %v1133_v59 = vpop.f32.mrf.mxu1 }
 0x56e   : > { %v1057_v60 = vpop.f32.mrf.mxu0 }
 0x56f   : > { %v4483_v61 = vadd.f32 %v1133_v59, %v1057_v60  ;;  %v3578_v62 = vpop.f32.mrf.mxu1 }
 0x570   : > { %v3573_v63 = vpop.f32.mrf.mxu0 }
 0x571   : > { %v1290_v1 = vpop.f32.mrf.mxu1 }
 0x572   : > { %v1213_v2 = vpop.f32.mrf.mxu0  ;;  %v1294_v3 = vsel %vm488_vm3, %v1290_v1, -inf }
 0x573   : > { %1295 = vmax.xlane.f32.xlu1 %v1294_v3  ;;  %v3588_v4 = vpop.f32.mrf.mxu1  ;;  %v1217_v5 = vsel %vm563_vm4, %v1213_v2, -inf }
 0x574   : > { %1218 = vmax.xlane.f32.xlu0 %v1217_v5  ;;  %v3583_v6 = vpop.f32.mrf.mxu0 }
 0x584   : > { %1388 = vrot.lane.b32.xlu1 %v4392_v10, %s4095_s3  ;;  %s4115_s3 = smov 20  }
 0x588   : > { %1715 = vrot.lane.b32.xlu1 %v4392_v10, %s4096_s14  ;;  %s4116_s14 = smov 24  }
 0x58a   : > { %1468 = vrot.lane.b32.xlu0 %v4392_v10, %s4097_s16  ;;  %s4117_s16 = smov 28  }
 0x58e   : > { %1547 = vrot.lane.b32.xlu0 %v4400_v13, %s4098_s29 }
 0x592   : > { %1466 = vrot.lane.b32.xlu0 %v4392_v10, %s4098_s29 }
 0x5fc   : > { %v1296_v7 = vpop.xlane.xlu1 %1295 }
 0x5fd   : > { %v1219_v8 = vpop.xlane.xlu0 %1218 }
 0x5fe   : > { %v1297_v9 = vmax.f32 %v1219_v8, %v1296_v7 }
 0x600   : > { %v1298_v11 = vsub.f32 %v1213_v2, %v1297_v9  ;;  %v1304_v12 = vsub.f32 %v1290_v1, %v1297_v9  ;;  %v1389_v14 = vpop.permute.xlu1 %1388 }
 0x601   : > { %3595 = vmatpush3.msra.mxu1 %v1389_v14  ;;  %v1469_v17 = vpop.permute.xlu0 %1468 }
 0x602   : > { %v1299_v15 = vmul.f32 1.442695, %v1298_v11  ;;  %v1305_v16 = vmul.f32 1.442695, %v1304_v12  ;;  %3604 = vmatprep.subr.mxu1 %v4086_v0 }
 0x604   : > { %3829 = vpow2.f32 %v1299_v15  ;;  %v1716_v23 = vpop.permute.xlu1 %1715 }
 0x605   : > { %3831 = vpow2.f32 %v1305_v16  ;;  %v1548_v18 = vpop.permute.xlu0 %1547 }
 0x609   : > { %v1467_v22 = vpop.permute.xlu0 %1466 }
 0x611   : > { %v4495_v19 = vpop.eup %3829 }
 0x612   : > { %v4497_v20 = vpop.eup %3831  ;;  %3597 = vmatmul.mubr.msk.f32.vlgmr.msra.gmra.mxu1 %vm563_vm4, %v4495_v19 }
 0x613   : > { %3592 = vmatmul.mubr.msk.f32.vlgmr.msra.gmra.mxu0 %vm488_vm3, %v4497_v20  ;;  %3605 = vmatpush3.xpose.msk.msra.mxu1 %vm488_vm3, %v1548_v18 }
 0x614   : > { %3600 = vmatpush3.xpose.msk.msra.mxu0 %vm488_vm3, %v1469_v17  ;;  %3601 = vmatprep.mubr.msk.f32.mxu0 %vm4087_vm0, %v4086_v0 }
 0x615   : > { %3606 = vmatprep.mubr.msk.f32.mxu1 %vm4087_vm0, %v4086_v0  ;;  %3614 = vmatprep.subr.mxu1 %v4086_v0 }
 0x616   : > { %3607 = vmatmul.mubr.msk.f32.vlgmr.msra.gmra.mxu1 %vm488_vm3, %v1467_v22  ;;  %3609 = vmatprep.subr.mxu0 %v4086_v0 }
 0x617   : > { %3602 = vmatmul.mubr.msk.f32.vlgmr.msra.gmra.mxu0 %vm488_vm3, %v1467_v22  ;;  %3615 = vmatpush3.msra.mxu1 %v1716_v23 }
 0x618   : > { %3611 = vmatprep.mubr.msk.f32.mxu0 %vm4087_vm0, %v4086_v0  ;;  %3616 = vmatprep.mubr.msk.f32.mxu1 %vm4087_vm0, %v4086_v0 }
 0x619   : > { %3624 = vmatprep.subr.mxu1 %v4086_v0 }
 0x6d2   : > { %v1460_v24 = vpop.f32.mrf.mxu1 }
 0x6d3   : > { %v1384_v25 = vpop.f32.mrf.mxu0 }
 0x6d4   : > { %v4518_v26 = vadd.f32 %v1460_v24, %v1384_v25  ;;  %v3598_v27 = vpop.f32.mrf.mxu1 }
 0x6d5   : > { %v3593_v28 = vpop.f32.mrf.mxu0 }
 0x6d6   : > { %v1617_v29 = vpop.f32.mrf.mxu1 }
 0x6d7   : > { %v1540_v30 = vpop.f32.mrf.mxu0  ;;  %v1621_v31 = vsel %vm488_vm3, %v1617_v29, -inf }
 0x6d8   : > { %1622 = vmax.xlane.f32.xlu1 %v1621_v31  ;;  %v3608_v34 = vpop.f32.mrf.mxu1  ;;  %v1544_v35 = vsel %vm563_vm4, %v1540_v30, -inf }
 0x6d9   : > { %1545 = vmax.xlane.f32.xlu0 %v1544_v35  ;;  %v3603_v36 = vpop.f32.mrf.mxu0 }
 0x6e9   : > { %1874 = vrot.lane.b32.xlu1 %v4400_v13, %s4099_s1 }
 0x6ef   : > { %1638 = vrot.lane.b32.xlu0 %v4418_v21, %s4098_s29 }
 0x6f3   : > { %1795 = vrot.lane.b32.xlu0 %v4392_v10, %s4100_s24  ;;  %s3451_s24 = sshll.u32 %s4180_s28, 7  ;;  %s4118_s28 = smov [#allocation12]  }
 0x6f7   : > { %1793 = vrot.lane.b32.xlu0 %v4392_v10, %s4099_s1 }
 0x761   : > { %v1623_v37 = vpop.xlane.xlu1 %1622 }
 0x762   : > { %v1546_v38 = vpop.xlane.xlu0 %1545 }
 0x763   : > { %v1624_v39 = vmax.f32 %v1546_v38, %v1623_v37 }
 0x765   : > { %v1625_v40 = vsub.f32 %v1540_v30, %v1624_v39  ;;  %v1631_v42 = vsub.f32 %v1617_v29, %v1624_v39  ;;  %v1875_v47 = vpop.permute.xlu1 %1874 }
 0x766   : > { %v1639_v43 = vpop.permute.xlu0 %1638 }
 0x767   : > { %v1626_v44 = vmul.f32 1.442695, %v1625_v40  ;;  %v1632_v45 = vmul.f32 1.442695, %v1631_v42  ;;  %3610 = vmatpush3.msk.msra.mxu0 %vm660_vm5, %v1639_v43 }
 0x768   : > { %3619 = vmatprep.subr.mxu0 %v4086_v0 }
 0x769   : > { %3833 = vpow2.f32 %v1626_v44 }
 0x76a   : > { %3835 = vpow2.f32 %v1632_v45  ;;  %v1796_v46 = vpop.permute.xlu0 %1795 }
 0x76e   : > { %v1794_v50 = vpop.permute.xlu0 %1793 }
 0x776   : > { %v4531_v48 = vpop.eup %3833 }
 0x777   : > { %v4533_v49 = vpop.eup %3835  ;;  %3617 = vmatmul.mubr.msk.f32.vlgmr.msra.gmra.mxu1 %vm563_vm4, %v4531_v48 }
 0x778   : > { %3612 = vmatmul.mubr.msk.f32.vlgmr.msra.gmra.mxu0 %vm488_vm3, %v4533_v49  ;;  %3625 = vmatpush3.xpose.msk.msra.mxu1 %vm488_vm3, %v1875_v47 }
 0x779   : > { %3620 = vmatpush3.xpose.msk.msra.mxu0 %vm488_vm3, %v1796_v46  ;;  %3621 = vmatprep.mubr.msk.f32.mxu0 %vm4087_vm0, %v4086_v0 }
 0x77a   : > { %3626 = vmatprep.mubr.msk.f32.mxu1 %vm4087_vm0, %v4086_v0  ;;  %3634 = vmatprep.subr.mxu1 %v4086_v0 }
 0x77b   : > { %3627 = vmatmul.mubr.msk.f32.vlgmr.msra.gmra.mxu1 %vm488_vm3, %v1794_v50  ;;  %3629 = vmatprep.subr.mxu0 %v4086_v0 }
 0x77c   : > { %3622 = vmatmul.mubr.msk.f32.vlgmr.msra.gmra.mxu0 %vm488_vm3, %v1794_v50  ;;  %3636 = vmatprep.mubr.msk.f32.mxu1 %vm4087_vm0, %v4086_v0 }
 0x77d   : > { %3631 = vmatprep.mubr.msk.f32.mxu0 %vm4087_vm0, %v4086_v0 }
 0x837   : > { %v1787_v51 = vpop.f32.mrf.mxu1 }
 0x838   : > { %v1711_v52 = vpop.f32.mrf.mxu0 }
 0x839   : > { %v4553_v53 = vadd.f32 %v1787_v51, %v1711_v52  ;;  %v3618_v54 = vpop.f32.mrf.mxu1 }
 0x83a   : > { %v3613_v57 = vpop.f32.mrf.mxu0 }
 0x83b   : > { %v1944_v58 = vpop.f32.mrf.mxu1 }
 0x83c   : > { %v1867_v59 = vpop.f32.mrf.mxu0  ;;  %v1948_v60 = vsel %vm488_vm3, %v1944_v58, -inf }
 0x83d   : > { %1949 = vmax.xlane.f32.xlu0 %v1948_v60  ;;  %v3628_v62 = vpop.f32.mrf.mxu1  ;;  %v1871_v63 = vsel %vm563_vm4, %v1867_v59, -inf }
 0x83e   : > { %1872 = vmax.xlane.f32.xlu1 %v1871_v63  ;;  %v3623_v1 = vpop.f32.mrf.mxu0 }
 0x84f   : > { %2042 = vrot.lane.b32.xlu1 %v4392_v10, %s4101_s9  ;;  %s393_s9 = scalar_lea.vmem [#allocation12], %s3384_s11  ;;  %s4009_s11 = sshll.u32 %s4118_s28, 4  ;;  %s4010_s11 = int_to_ptr.vmem [resolvable:$false] %s4009_s11 }
 0x853   : > { %2122 = vrot.lane.b32.xlu1 %v4392_v10, %s4102_s18  ;;  %1965 = vrot.lane.b32.xlu0 %v4418_v21, %s4099_s1  ;;  %s3240_s18 = sshll.u32 %s393_s9, 4  ;;  %s3241_s18 = int_to_ptr.vmem [resolvable:$true] %s3240_s18 }
 0x854   : > { %p4012_p0 = scmp.lt.s32.totalorder %s3241_s18, %s4010_s11 }
 0x857   : > { %2120 = vrot.lane.b32.xlu1 %v4392_v10, %s4103_s10  ;;  %2201 = vrot.lane.b32.xlu0 %v4400_v13, %s4103_s10 }
 0x85b   : > { %2369 = vrot.lane.b32.xlu1 %v4392_v10, %s4104_s26 }
 0x8c6   : > { %v1950_v2 = vpop.xlane.xlu0 %1949 }
 0x8c7   : > { %v1873_v3 = vpop.xlane.xlu1 %1872 }
 0x8c8   : > { %v1951_v4 = vmax.f32 %v1873_v3, %v1950_v2 }
 0x8ca   : > { %v1952_v5 = vsub.f32 %v1867_v59, %v1951_v4  ;;  %v1958_v6 = vsub.f32 %v1944_v58, %v1951_v4  ;;  %v1966_v7 = vpop.permute.xlu0 %1965 }
 0x8cb   : > { %v2043_v8 = vpop.permute.xlu1 %2042  ;;  %3630 = vmatpush3.msk.msra.mxu0 %vm660_vm5, %v1966_v7 }
 0x8cc   : > { %v1953_v9 = vmul.f32 1.442695, %v1952_v5  ;;  %v1959_v11 = vmul.f32 1.442695, %v1958_v6  ;;  %3635 = vmatpush3.msra.mxu1 %v2043_v8  ;;  %3639 = vmatprep.subr.mxu0 %v4086_v0 }
 0x8cd   : > { %3644 = vmatprep.subr.mxu1 %v4086_v0 }
 0x8ce   : > { %3837 = vpow2.f32 %v1953_v9  ;;  %v2202_v15 = vpop.permute.xlu0 %2201 }
 0x8cf   : > { %3839 = vpow2.f32 %v1959_v11  ;;  %v2123_v12 = vpop.permute.xlu1 %2122 }
 0x8d3   : > { %v2121_v14 = vpop.permute.xlu1 %2120 }
 0x8d7   : > { %v2370_v18 = vpop.permute.xlu1 %2369 }
 0x8db   : > { %v4569_v16 = vpop.eup %3837 }
 0x8dc   : > { %v4571_v17 = vpop.eup %3839  ;;  %3637 = vmatmul.mubr.msk.f32.vlgmr.msra.gmra.mxu1 %vm563_vm4, %v4569_v16 }
 0x8dd   : > { %3632 = vmatmul.mubr.msk.f32.vlgmr.msra.gmra.mxu0 %vm488_vm3, %v4571_v17  ;;  %3645 = vmatpush3.xpose.msk.msra.mxu1 %vm488_vm3, %v2202_v15 }
 0x8de   : > { %3640 = vmatpush3.xpose.msk.msra.mxu0 %vm488_vm3, %v2123_v12  ;;  %3641 = vmatprep.mubr.msk.f32.mxu0 %vm4087_vm0, %v4086_v0 }
 0x8df   : > { %3646 = vmatprep.mubr.msk.f32.mxu1 %vm4087_vm0, %v4086_v0  ;;  %3654 = vmatprep.subr.mxu1 %v4086_v0 }
 0x8e0   : > { %3647 = vmatmul.mubr.msk.f32.vlgmr.msra.gmra.mxu1 %vm488_vm3, %v2121_v14  ;;  %3649 = vmatprep.subr.mxu0 %v4086_v0 }
 0x8e1   : > { %3642 = vmatmul.mubr.msk.f32.vlgmr.msra.gmra.mxu0 %vm488_vm3, %v2121_v14  ;;  %3655 = vmatpush3.msra.mxu1 %v2370_v18 }
 0x8e2   : > { %3651 = vmatprep.mubr.msk.f32.mxu0 %vm4087_vm0, %v4086_v0  ;;  %3656 = vmatprep.mubr.msk.f32.mxu1 %vm4087_vm0, %v4086_v0 }
 0x8e3   : > { %3664 = vmatprep.subr.mxu1 %v4086_v0 }
 0x99c   : > { %v2114_v22 = vpop.f32.mrf.mxu1 }
 0x99d   : > { %v2038_v23 = vpop.f32.mrf.mxu0 }
 0x99e   : > { %v4592_v24 = vadd.f32 %v2114_v22, %v2038_v23  ;;  %v3638_v25 = vpop.f32.mrf.mxu1 }
 0x99f   : > { %v3633_v27 = vpop.f32.mrf.mxu0 }
 0x9a0   : > { %v2271_v28 = vpop.f32.mrf.mxu1 }
 0x9a1   : > { %v2194_v29 = vpop.f32.mrf.mxu0  ;;  %v2275_v30 = vsel %vm488_vm3, %v2271_v28, -inf }
 0x9a2   : > { %2276 = vmax.xlane.f32.xlu1 %v2275_v30  ;;  %v3648_v31 = vpop.f32.mrf.mxu1  ;;  %v2198_v34 = vsel %vm563_vm4, %v2194_v29, -inf }
 0x9a3   : > { %2199 = vmax.xlane.f32.xlu0 %v2198_v34  ;;  %v3643_v35 = vpop.f32.mrf.mxu0 }
 0x9b3   : > { %2528 = vrot.lane.b32.xlu1 %v4400_v13, %s4105_s20 }
 0x9b9   : > { %2292 = vrot.lane.b32.xlu0 %v4418_v21, %s4103_s10 }
 0x9bd   : > { %2449 = vrot.lane.b32.xlu0 %v4392_v10, %s4106_s30 }
 0x9c1   : > { %2447 = vrot.lane.b32.xlu0 %v4392_v10, %s4105_s20 }
 0xa2b   : > { %v2277_v36 = vpop.xlane.xlu1 %2276 }
 0xa2c   : > { %v2200_v37 = vpop.xlane.xlu0 %2199 }
 0xa2d   : > { %v2278_v38 = vmax.f32 %v2200_v37, %v2277_v36 }
 0xa2f   : > { %v2279_v39 = vsub.f32 %v2194_v29, %v2278_v38  ;;  %v2285_v40 = vsub.f32 %v2271_v28, %v2278_v38  ;;  %v2529_v46 = vpop.permute.xlu1 %2528 }
 0xa30   : > { %v2293_v42 = vpop.permute.xlu0 %2292 }
 0xa31   : > { %v2280_v43 = vmul.f32 1.442695, %v2279_v39  ;;  %v2286_v44 = vmul.f32 1.442695, %v2285_v40  ;;  %3650 = vmatpush3.msk.msra.mxu0 %vm660_vm5, %v2293_v42  ;;  %v980_v39 = vsel %vm488_vm3, %v4461_v56, 0.0  ;;  %v974_v40 = vsel %vm563_vm4, %v4459_v55, 0.0 }
 0xa32   : > { %3659 = vmatprep.subr.mxu0 %v4086_v0  ;;  %v1628_v42 = vsel %vm563_vm4, %v4531_v48, 0.0  ;;  %v1634_v56 = vsel %vm488_vm3, %v4533_v49, 0.0 }
 0xa33   : > { %3841 = vpow2.f32 %v2280_v43  ;;  %v1301_v43 = vsel %vm563_vm4, %v4495_v19, 0.0  ;;  %v1961_v19 = vsel %vm488_vm3, %v4571_v17, 0.0 }
 0xa34   : > { %3843 = vpow2.f32 %v2286_v44  ;;  %v2450_v45 = vpop.permute.xlu0 %2449 }
 0xa38   : > { %v2448_v51 = vpop.permute.xlu0 %2447 }
 0xa40   : > { %v4605_v47 = vpop.eup %3841 }
 0xa41   : > { %v4607_v50 = vpop.eup %3843  ;;  %3657 = vmatmul.mubr.msk.f32.vlgmr.msra.gmra.mxu1 %vm563_vm4, %v4605_v47  ;;  %v2282_v55 = vsel %vm563_vm4, %v4605_v47, 0.0 }
 0xa42   : > { %3652 = vmatmul.mubr.msk.f32.vlgmr.msra.gmra.mxu0 %vm488_vm3, %v4607_v50  ;;  %3665 = vmatpush3.xpose.msk.msra.mxu1 %vm488_vm3, %v2529_v46 }
 0xa43   : > { %3660 = vmatpush3.xpose.msk.msra.mxu0 %vm488_vm3, %v2450_v45  ;;  %3661 = vmatprep.mubr.msk.f32.mxu0 %vm4087_vm0, %v4086_v0 }
 0xa44   : > { %3666 = vmatprep.mubr.msk.f32.mxu1 %vm4087_vm0, %v4086_v0  ;;  %3674 = vmatprep.subr.mxu1 %v4086_v0 }
 0xa45   : > { %3667 = vmatmul.mubr.msk.f32.vlgmr.msra.gmra.mxu1 %vm488_vm3, %v2448_v51  ;;  %3669 = vmatprep.subr.mxu0 %v4086_v0 }
 0xa46   : > { %3662 = vmatmul.mubr.msk.f32.vlgmr.msra.gmra.mxu0 %vm488_vm3, %v2448_v51  ;;  %3676 = vmatprep.mubr.msk.f32.mxu1 %vm4087_vm0, %v4086_v0 }
 0xa47   : > { %3671 = vmatprep.mubr.msk.f32.mxu0 %vm4087_vm0, %v4086_v0 }
 0xb01   : > { %v2441_v52 = vpop.f32.mrf.mxu1 }
 0xb02   : > { %v2365_v54 = vpop.f32.mrf.mxu0 }
 0xb03   : > { %v4627_v57 = vadd.f32 %v2441_v52, %v2365_v54  ;;  %v3658_v58 = vpop.f32.mrf.mxu1 }
 0xb04   : > { %v3653_v59 = vpop.f32.mrf.mxu0 }
 0xb05   : > { %v2598_v60 = vpop.f32.mrf.mxu1 }
 0xb06   : > { %v2521_v62 = vpop.f32.mrf.mxu0  ;;  %v2602_v63 = vsel %vm488_vm3, %v2598_v60, -inf }
 0xb07   : > { %2603 = vmax.xlane.f32.xlu0 %v2602_v63  ;;  %v3668_v1 = vpop.f32.mrf.mxu1  ;;  %v2525_v2 = vsel %vm563_vm4, %v2521_v62, -inf  ;;  %v653_v63 = vsel %vm488_vm3, %v4432_v32, 0.0 }
 0xb08   : > { %2526 = vmax.xlane.f32.xlu1 %v2525_v2  ;;  %v3663_v3 = vpop.f32.mrf.mxu0 }
 0xb19   : > { %2696 = vrot.lane.b32.xlu1 %v4392_v10, %s4107_s23  ;;  %s3227_s23 = scalar_lea.sflag [#allocation5], %s4352_s21 }
 0xb1d   : > { %2776 = vrot.lane.b32.xlu1 %v4392_v10, %s4108_s8  ;;  %2619 = vrot.lane.b32.xlu0 %v4418_v21, %s4105_s20  ;;  %s4811_s20 = sld [smem:[#allocation24_spill]]  ;;  %s4005_s8 = scalar_lea.vmem %s3241_s18, 128 }
 0xb1e   : > { %p4006_p8 = scmp.ne.s32.totalorder %s3241_s18, %s4005_s8 }
 0xb20   : > { %p4007_p12 = pnand %p4006_p8, %p4812_p11 }
 0xb21   : > { %2774 = vrot.lane.b32.xlu1 %v4392_v10, %s4109_s7  ;;  %2855 = vrot.lane.b32.xlu0 %v4400_v13, %s4109_s7 }
 0xb22   : > { %p4008_p7 = pneg %p4007_p12 }
 0xb23   : > { %s4721_s30 = scalar_lea.hbm %s4811_s20, %s3451_s24 }
 0xb90   : > { %v2604_v4 = vpop.xlane.xlu0 %2603 }
 0xb91   : > { %v2527_v5 = vpop.xlane.xlu1 %2526 }
 0xb92   : > { %v2605_v6 = vmax.f32 %v2527_v5, %v2604_v4 }
 0xb94   : > { %v2606_v7 = vsub.f32 %v2521_v62, %v2605_v6  ;;  %v2612_v8 = vsub.f32 %v2598_v60, %v2605_v6  ;;  %v2620_v9 = vpop.permute.xlu0 %2619  ;;  %v647_v62 = vsel %vm563_vm4, %v4439_v33, 0.0 }
 0xb95   : > { %v2697_v11 = vpop.permute.xlu1 %2696  ;;  %3670 = vmatpush3.msk.msra.mxu0 %vm660_vm5, %v2620_v9 }
 0xb96   : > { %v2607_v12 = vmul.f32 1.442695, %v2606_v7  ;;  %v2613_v14 = vmul.f32 1.442695, %v2612_v8  ;;  %3675 = vmatpush3.msra.mxu1 %v2697_v11  ;;  %3679 = vmatprep.subr.mxu0 %v4086_v0 }
 0xb97   : > { %3684 = vmatprep.subr.mxu1 %v4086_v0 }
 0xb98   : > { %3845 = vpow2.f32 %v2607_v12  ;;  %v2856_v13 = vpop.permute.xlu0 %2855 }
 0xb99   : > { %3847 = vpow2.f32 %v2613_v14  ;;  %v2777_v15 = vpop.permute.xlu1 %2776 }
 0xb9d   : > { %v2775_v23 = vpop.permute.xlu1 %2774 }
 0xba5   : > { %v3846_v18 = vpop.eup %3845 }
 0xba6   : > { %v3848_v22 = vpop.eup %3847  ;;  %3677 = vmatmul.mubr.msk.f32.vlgmr.msra.gmra.mxu1 %vm563_vm4, %v3846_v18  ;;  %v2609_v48 = vsel %vm563_vm4, %v3846_v18, 0.0 }
 0xba7   : > { %3672 = vmatmul.mubr.msk.f32.vlgmr.msra.gmra.mxu0 %vm488_vm3, %v3848_v22  ;;  %3685 = vmatpush3.xpose.msk.msra.mxu1 %vm488_vm3, %v2856_v13 }
 0xba8   : > { %3680 = vmatpush3.xpose.msk.msra.mxu0 %vm488_vm3, %v2777_v15  ;;  %3681 = vmatprep.mubr.msk.f32.mxu0 %vm4087_vm0, %v4086_v0 }
 0xba9   : > { %3686 = vmatprep.mubr.msk.f32.mxu1 %vm4087_vm0, %v4086_v0  ;;  %3694 = vmatprep.subr.mxu1 %v4086_v0 }
 0xbaa   : > { %3687 = vmatmul.mubr.msk.f32.vlgmr.msra.gmra.mxu1 %vm488_vm3, %v2775_v23  ;;  %3689 = vmatprep.subr.mxu0 %v4086_v0 }
 0xbab   : > { %3682 = vmatmul.mubr.msk.f32.vlgmr.msra.gmra.mxu0 %vm488_vm3, %v2775_v23  ;;  %3696 = vmatprep.mubr.msk.f32.mxu1 %vm4087_vm0, %v4086_v0 }
 0xbac   : > { %3691 = vmatprep.mubr.msk.f32.mxu0 %vm4087_vm0, %v4086_v0 }
 0xc66   : > { %v2768_v25 = vpop.f32.mrf.mxu1 }
 0xc67   : > { %v2692_v27 = vpop.f32.mrf.mxu0 }
 0xc68   : > { %v4658_v28 = vadd.f32 %v2768_v25, %v2692_v27  ;;  %v3678_v29 = vpop.f32.mrf.mxu1 }
 0xc69   : > { %v3673_v30 = vpop.f32.mrf.mxu0 }
 0xc6a   : > { %v2925_v31 = vpop.f32.mrf.mxu1 }
 0xc6b   : > { %v2848_v34 = vpop.f32.mrf.mxu0  ;;  %v2929_v35 = vsel %vm488_vm3, %v2925_v31, -inf }
 0xc6c   : > { %2930 = vmax.xlane.f32.xlu1 %v2929_v35  ;;  %v3688_v36 = vpop.f32.mrf.mxu1  ;;  %v2852_v37 = vsel %vm563_vm4, %v2848_v34, -inf }
 0xc6d   : > { %2853 = vmax.xlane.f32.xlu0 %v2852_v37  ;;  %v3683_v38 = vpop.f32.mrf.mxu0  ;;  %v3144_v37 = vld [vmem:[#allocation11 + $0x18] sm:$0xff] }
 0xc6e   : > { %v3143_v38 = vld [vmem:[#allocation11 + $0x10] sm:$0xff] }
 0xc7d   : > { %3023 = vrot.lane.b32.xlu1 %v4392_v10, %s4110_s15  ;;  %v1955_v10 = vsel %vm563_vm4, %v4569_v16, 0.0  ;;  %v2288_v16 = vsel %vm488_vm3, %v4607_v50, 0.0 }
 0xc83   : > { %2946 = vrot.lane.b32.xlu0 %v4418_v21, %s4109_s7  ;;  %v1307_v21 = vsel %vm488_vm3, %v4497_v20, 0.0  ;;  %v2615_v20 = vsel %vm488_vm3, %v3848_v22, 0.0  ;;  %s4011_s7 = scalar_lea.vmem %s4010_s11, 256 }
 0xc84   : > { %p4013_p3 = scmp.lt.s32.totalorder %s4011_s7, %s4005_s8 }
 0xc86   : > { %p4014_p5 = por %p4013_p3, %p4012_p0 }
 0xc88   : > { %p4015_p2 = pnand %p4014_p5, %p4008_p7 }
 0xca1   : > { %981 = vadd.xlane.f32.xlu1 %v980_v39  ;;  %v3142_v39 = vld [vmem:[#allocation11 + $0x8] sm:$0xff] }
 0xca2   : > { %975 = vadd.xlane.f32.xlu0 %v974_v40 }
 0xca5   : > { %1629 = vadd.xlane.f32.xlu1 %v1628_v42  ;;  %v3141_v42 = vld [vmem:[#allocation11] sm:$0xff] }
 0xca6   : > { %1302 = vadd.xlane.f32.xlu0 %v1301_v43 }
 0xca9   : > { %1956 = vadd.xlane.f32.xlu1 %v1955_v10 }
 0xcaa   : > { %1308 = vadd.xlane.f32.xlu0 %v1307_v21 }
 0xcad   : > { %2283 = vadd.xlane.f32.xlu1 %v2282_v55 }
 0xcae   : > { %1635 = vadd.xlane.f32.xlu0 %v1634_v56 }
 0xcb1   : > { %2610 = vadd.xlane.f32.xlu1 %v2609_v48 }
 0xcb2   : > { %1962 = vadd.xlane.f32.xlu0 %v1961_v19 }
 0xcb6   : > { %2289 = vadd.xlane.f32.xlu0 %v2288_v16 }
 0xcba   : > { %2616 = vadd.xlane.f32.xlu0 %v2615_v20 }
 0xcf5   : > { %v2931_v44 = vpop.xlane.xlu1 %2930 }
 0xcf6   : > { %v2854_v45 = vpop.xlane.xlu0 %2853 }
 0xcf7   : > { %v2932_v46 = vmax.f32 %v2854_v45, %v2931_v44 }
 0xcf9   : > { %v2933_v47 = vsub.f32 %v2848_v34, %v2932_v46  ;;  %v2939_v49 = vsub.f32 %v2925_v31, %v2932_v46  ;;  %v3024_v51 = vpop.permute.xlu1 %3023 }
 0xcfa   : > { %3695 = vmatpush3.msra.mxu1 %v3024_v51  ;;  %v2947_v52 = vpop.permute.xlu0 %2946 }
 0xcfb   : > { %v2934_v54 = vmul.f32 1.442695, %v2933_v47  ;;  %v2940_v58 = vmul.f32 1.442695, %v2939_v49  ;;  %3690 = vmatpush3.msk.msra.mxu0 %vm660_vm5, %v2947_v52 }
 0xcfc   : > { %3699 = vmatprep.subr.mxu0 %v4086_v0 }
 0xcfd   : > { %3849 = vpow2.f32 %v2934_v54 }
 0xcfe   : > { %3851 = vpow2.f32 %v2940_v58 }
 0xd0a   : > { %v3850_v17 = vpop.eup %3849 }
 0xd0b   : > { %v3852_v50 = vpop.eup %3851  ;;  %3697 = vmatmul.mubr.msk.f32.vlgmr.msra.gmra.mxu1 %vm563_vm4, %v3850_v17  ;;  %v2936_v59 = vsel %vm563_vm4, %v3850_v17, 0.0 }
 0xd0c   : > { %3692 = vmatmul.mubr.msk.f32.vlgmr.msra.gmra.mxu0 %vm488_vm3, %v3852_v50  ;;  %v2942_v60 = vsel %vm488_vm3, %v3852_v50, 0.0  ;;  %2937 = vadd.xlane.f32.xlu1 %v2936_v59 }
 0xd0d   : > { %2943 = vadd.xlane.f32.xlu0 %v2942_v60  ;;  %3707 = vmatprep.mubr.msk.f32.mxu0 %vm4087_vm0, %v4086_v0 }
 0xd0e   : > { %3700 = vmatpush3.msra.mxu0 %v3144_v37 }
 0xd0f   : > { %3701 = vmatprep.subr.mxu0 %v4086_v0 }
 0xd10   : > { %648 = vadd.xlane.f32.xlu1 %v647_v62  ;;  %3702 = vmatpush3.msra.mxu0 %v3143_v38 }
 0xd11   : > { %654 = vadd.xlane.f32.xlu0 %v653_v63  ;;  %3703 = vmatprep.subr.mxu0 %v4086_v0  ;;  %v3448_v63 = vld [vmem:[%s4765_s6] ss:$0 sm:$0xff] }
 0xd12   : > { %3704 = vmatpush3.msra.mxu0 %v3142_v39 }
 0xd13   : > { %3705 = vmatprep.subr.mxu0 %v4086_v0 }
 0xd14   : > { %3706 = vmatpush3.msra.mxu0 %v3141_v42 }
 0xd2a   : > { %v982_v1 = vpop.xlane.xlu1 %981 }
 0xd2b   : > { %v976_v2 = vpop.xlane.xlu0 %975 }
 0xd2c   : > { %v983_v3 = vadd.f32 %v982_v1, %v976_v2 }
 0xd2e   : > { %3853 = vrcp.f32 %v983_v3  ;;  %v1630_v5 = vpop.xlane.xlu1 %1629 }
 0xd2f   : > { %v1303_v4 = vpop.xlane.xlu0 %1302 }
 0xd32   : > { %v1957_v8 = vpop.xlane.xlu1 %1956 }
 0xd33   : > { %v1309_v6 = vpop.xlane.xlu0 %1308 }
 0xd34   : > { %v1310_v7 = vadd.f32 %v1309_v6, %v1303_v4 }
 0xd36   : > { %3855 = vrcp.f32 %v1310_v7  ;;  %v2284_v15 = vpop.xlane.xlu1 %2283 }
 0xd37   : > { %v1636_v9 = vpop.xlane.xlu0 %1635 }
 0xd38   : > { %v1637_v11 = vadd.f32 %v1636_v9, %v1630_v5 }
 0xd3a   : > { %3857 = vrcp.f32 %v1637_v11  ;;  %v2611_v23 = vpop.xlane.xlu1 %2610 }
 0xd3b   : > { %v3854_v12 = vpop.eup %3853  ;;  %v1963_v33 = vpop.xlane.xlu0 %1962 }
 0xd3c   : > { %v1964_v14 = vadd.f32 %v1963_v33, %v1957_v8  ;;  %v1138_v32 = vmul.f32 %v3854_v12, %v4483_v61 }
 0xd3e   : > { %3859 = vrcp.f32 %v1964_v14  ;;  %3102 = vrot.lane.b32.xlu1 %v1138_v32, %s4111_s12 }
 0xd3f   : > { %v2290_v13 = vpop.xlane.xlu0 %2289 }
 0xd40   : > { %v2291_v18 = vadd.f32 %v2290_v13, %v2284_v15 }
 0xd42   : > { %3861 = vrcp.f32 %v2291_v18 }
 0xd43   : > { %v3856_v22 = vpop.eup %3855  ;;  %v2617_v25 = vpop.xlane.xlu0 %2616 }
 0xd44   : > { %v2618_v27 = vadd.f32 %v2617_v25, %v2611_v23  ;;  %v1465_v29 = vmul.f32 %v3856_v22, %v4518_v26 }
 0xd46   : > { %3863 = vrcp.f32 %v2618_v27  ;;  %3106 = vrot.lane.b32.xlu0 %v1465_v29, %s4112_s13 }
 0xd47   : > { %v3858_v30 = vpop.eup %3857 }
 0xd48   : > { %v1792_v31 = vmul.f32 %v3858_v30, %v4553_v53 }
 0xd4a   : > { %3110 = vrot.lane.b32.xlu1 %v1792_v31, %s4113_s17 }
 0xd4b   : > { %v3860_v61 = vpop.eup %3859 }
 0xd4c   : > { %v2119_v34 = vmul.f32 %v3860_v61, %v4592_v24 }
 0xd4e   : > { %3114 = vrot.lane.b32.xlu1 %v2119_v34, %s4114_s19 }
 0xd4f   : > { %v3862_v35 = vpop.eup %3861 }
 0xd50   : > { %v2446_v36 = vmul.f32 %v3862_v35, %v4627_v57 }
 0xd52   : > { %3118 = vrot.lane.b32.xlu0 %v2446_v36, %s4115_s3 }
 0xd53   : > { %v3864_v26 = vpop.eup %3863 }
 0xd54   : > { %v2773_v53 = vmul.f32 %v3864_v26, %v4658_v28 }
 0xd56   : > { %3122 = vrot.lane.b32.xlu1 %v2773_v53, %s4116_s14 }
 0xd95   : > { %v2938_v24 = vpop.xlane.xlu1 %2937 }
 0xd96   : > { %v2944_v57 = vpop.xlane.xlu0 %2943 }
 0xd97   : > { %v2945_v40 = vadd.f32 %v2944_v57, %v2938_v24 }
 0xd99   : > { %3865 = vrcp.f32 %v2945_v40  ;;  %v649_v19 = vpop.xlane.xlu1 %648 }
 0xd9a   : > { %v655_v16 = vpop.xlane.xlu0 %654 }
 0xd9b   : > { %v656_v20 = vadd.f32 %v655_v16, %v649_v19 }
 0xd9d   : > { %3867 = vrcp.f32 %v656_v20 }
 0xda6   : > { %v3866_v56 = vpop.eup %3865 }
 0xdaa   : > { %v3868_v45 = vpop.eup %3867 }
 0xdab   : > { %v811_v47 = vmul.f32 %v3868_v45, %v4452_v41 }
 0xdb0   : > { %v3103_v0 = vpop.permute.xlu1 %3102 }
 0xdb1   : > { %v3129_v51 = vsel %vm488_vm3, %v811_v47, %v3103_v0 }
 0xdb8   : > { %v3107_v46 = vpop.permute.xlu0 %3106 }
 0xdb9   : > { %v3130_v52 = vsel %vm563_vm4, %v3129_v51, %v3107_v46 }
 0xdbc   : > { %v3111_v44 = vpop.permute.xlu1 %3110 }
 0xdbd   : > { %v3132_v58 = vsel %vm3131_vm6, %v3130_v52, %v3111_v44 }
 0xdc0   : > { %v3115_v49 = vpop.permute.xlu1 %3114 }
 0xdc1   : > { %v3134_v50 = vsel %vm3133_vm7, %v3132_v58, %v3115_v49 }
 0xdc4   : > { %v3119_v54 = vpop.permute.xlu0 %3118 }
 0xdc5   : > { %v3136_v59 = vsel %vm3135_vm8, %v3134_v50, %v3119_v54 }
 0xdc8   : > { %v3123_v17 = vpop.permute.xlu1 %3122 }
 0xdc9   : > { %v3138_v60 = vsel %vm3137_vm9, %v3136_v59, %v3123_v17 }
 0xdcb   : > { %v3095_v43 = vpop.f32.mrf.mxu1 }
 0xdcc   : > { %v3019_v10 = vpop.f32.mrf.mxu0 }
 0xdcd   : > { %v3096_v21 = vadd.f32 %v3095_v43, %v3019_v10  ;;  %v3698_v55 = vpop.f32.mrf.mxu1 }
 0xdce   : > { %v3693_v28 = vpop.f32.mrf.mxu0 }
 0xdcf   : > { %v3100_v48 = vmul.f32 %v3866_v56, %v3096_v21 }
 0xdd1   : > { %3126 = vrot.lane.b32.xlu0 %v3100_v48, %s4117_s16 }
 0xe43   : > { %v3127_v41 = vpop.permute.xlu0 %3126 }
 0xe44   : > { %v3140_v62 = vsel %vm3139_vm10, %v3138_v60, %v3127_v41 }
 0xe45   : > { %3708 = vmatmul.mubr.msk.f32.vlgmr.msra.gmra.mxu0 %vm406_vm1, %v3140_v62 }
 0xf05   : > { %v3221_v1 = vpop.f32.mrf.mxu0 }
 0xf06   : > { %v3222_v2 = vadd.f32 %v3448_v63, %v3221_v1 }
 0xf07   : > { %v3709_v3 = vpop.f32.mrf.mxu0 }
 0xf08   : > { %3225 = vst.msk [vmem:[%s393_s9] sm:$0xff] %vm406_vm1, %v3222_v2 }
 0xf09   : > { %4018 = shalt.err (!%p4015_p2)
}
 0xf0a   : > { %s4019_s15 = scalar_lea.hbm %s4721_s30, 128  ;;  %s4023_s13 = scalar_lea.hbm %s4811_s20, 256 }
 0xf0b   : > { %p4020_p13 = scmp.ne.s32.totalorder %s4721_s30, %s4019_s15  ;;  %p4024_p10 = scmp.lt.s32.totalorder %s4721_s30, %s4811_s20 }
 0xf0c   : > { %p4025_p9 = scmp.lt.s32.totalorder %s4023_s13, %s4019_s15 }
 0xf0d   : > { %p4021_p1 = pnand %p4020_p13, %p4812_p11 }
 0xf0e   : > { %p4026_p6 = por %p4025_p9, %p4024_p10 }
 0xf0f   : > { %p4022_p4 = pneg %p4021_p1 }
 0xf11   : > { %p4027_p8 = pnand %p4026_p6, %p4022_p4 }
 0xf13   : > { %4030 = shalt.err (!%p4027_p8)
}
 0xf14   : > { %3724 = dma.vmem_to_hbm [thread:$0]  (%p4812_p11), %s3241_s18, 128, %s4721_s30, %s3227_s23  }
 0xf15 PF: > { %s4813_s3 = sld [smem:[#allocation17_spill]]  ;;  %p4816_p7 = scmp.ge.s32.totalorder %s4077_s27, 2 }
 0xf16   : > { %s4814_s14 = sld [smem:[#allocation19_spill]] }
 0xf1b   : > { %s3252_s16 = sand.u32 1, %s4813_s3  }
 0xf1c   : > { %p4815_p12 = scmp.ne.s32.totalorder %s4814_s14, 0  ;;  %s3253_s29 = scalar_lea.sflag [#allocation5], %s3252_s16 }
 0xf1e   : > { %p3744_p0 = pnand %p4816_p7, %p4815_p12 }
 0xf20   : > { %p3745_p3 = pneg %p3744_p0 }
 0xf22   : > { %4060 = dma.done.wait (%p3745_p3), %s3253_s29, 128  }
 0xf23   : > { %4062 = vsyncadd (%p3745_p3), %s3253_s29, 4294967168  ;;  %s4817_s27 = sld [smem:[#allocation20_spill]]  ;;  %s4820_s24 = smov %s4069_s25 }
 0xf24   : > { %s4818_s1 = sld [smem:[#allocation18_spill]] }
 0xf25   : > { %s4819_s26 = sld [smem:[#allocation21_spill]] }
 0xf29   : > { %p24_p5 = scmp.ge.s32.totalorder %s4817_s27, 4  }
 0xf2a   : > { %s4821_s25 = smov %s4818_s1 }
 0xf2b   :  { %26 = sbr.rel (!%p24_p5) target bundleno = 12 (0xc), region = 125 }
 0xf30   :  { %3258 = vsyncpa [#allocation4], 1 }
 0xf31   :  { %3260 = vsyncpa [#allocation4 + $0x1], 1 }
 0xf32   :  { %3261 = vsyncpa [#allocation7], 1 }
 0xf33   :  { %3263 = vsyncpa [#allocation7 + $0x1], 1 }
 0xf34   :  { %3264 = vsyncpa [#allocation10], 1 }
 0xf35   :  { %3265 = vsyncpa [#allocation5], 1 }
 0xf36   :  { %3267 = vsyncpa [#allocation5 + $0x1], 1 }

</bundles_post_ra>
